<compile_context>
chip_gen: v7x
topology: tpu7x:2x2x1
jax: 0.10.0
libtpu: 0.0.40
codegen_flags: <defaults>
</compile_context>

<pallas_src>
import jax
import jax.numpy as jnp
from jax.experimental import pallas as pl
from jax.experimental.pallas import tpu as pltpu

# ----------------------------- tiny BERT config -----------------------------
VOCAB = 64
HIDDEN = 32
HEADS = 2
HEAD_DIM = HIDDEN // HEADS
INTERMEDIATE = 64
LAYERS = 2
MAX_POS = 16
SEQ = 8
BATCH = 2
LN_EPS = 1e-12


# ----------------------------- fused Pallas kernel ---------------------------
def _bert_forward_kernel(
    emb_ref, mask_ref,
    emb_ln_g_ref, emb_ln_b_ref,
    wqkv_ref, bqkv_ref, wo_ref, bo_ref, ln1_g_ref, ln1_b_ref,
    wi_ref, bi_ref, wf_ref, bf_ref, ln2_g_ref, ln2_b_ref,
    pooler_w_ref, pooler_b_ref,
    out_ref,
):
    """One grid step = one field's full batch: embeddings LN -> L transformer layers -> pooler."""
    B, S = mask_ref.shape  # per-field batch and sequence length (static)

    def layernorm(h, g, b):
        mean = jnp.mean(h, axis=-1, keepdims=True)
        var = jnp.mean((h - mean) ** 2, axis=-1, keepdims=True)
        return (h - mean) * jax.lax.rsqrt(var + LN_EPS) * g + b

    # Attention mask bias: layer-invariant, compute ONCE (hoisted out of the layer loop).
    neg_bias = (1.0 - mask_ref[...]) * (-1e9)  # [B, S]

    # Embedding layernorm.
    x = layernorm(emb_ref[...], emb_ln_g_ref[...], emb_ln_b_ref[...])  # [B*S, HIDDEN]
    scale = 1.0 / jnp.sqrt(jnp.float32(HEAD_DIM))

    for l in range(LAYERS):  # unrolled; all weights stay resident in VMEM
        # --- fused QKV projection: single MXU push [B*S, H] x [H, 3H] ---
        qkv = jnp.dot(x, wqkv_ref[l], preferred_element_type=jnp.float32) + bqkv_ref[l]

        # --- multi-head self-attention with explicit 2-D dots per (batch, head) ---
        ctx_parts = []
        for b in range(B):
            rows = slice(b * S, (b + 1) * S)
            q_b = qkv[rows, 0 * HIDDEN:1 * HIDDEN]   # [S, HIDDEN]
            k_b = qkv[rows, 1 * HIDDEN:2 * HIDDEN]
            v_b = qkv[rows, 2 * HIDDEN:3 * HIDDEN]
            bias_b = neg_bias[b:b + 1, :]            # [1, S] -> broadcasts over query rows
            head_outs = []
            for h in range(HEADS):
                cols = slice(h * HEAD_DIM, (h + 1) * HEAD_DIM)
                q = q_b[:, cols]                     # [S, D]
                k = k_b[:, cols]
                v = v_b[:, cols]
                s = jnp.dot(q, k.T, preferred_element_type=jnp.float32) * scale + bias_b
                m = jnp.max(s, axis=-1, keepdims=True)
                p = jnp.exp(s - m)
                p = p / jnp.sum(p, axis=-1, keepdims=True)
                head_outs.append(jnp.dot(p, v, preferred_element_type=jnp.float32))
            ctx_parts.append(jnp.concatenate(head_outs, axis=-1))   # [S, HIDDEN]
        ctx = jnp.concatenate(ctx_parts, axis=0)                    # [B*S, HIDDEN]

        # --- attention output projection + residual layernorm ---
        attn_out = jnp.dot(ctx, wo_ref[l], preferred_element_type=jnp.float32) + bo_ref[l]
        x = layernorm(attn_out + x, ln1_g_ref[l], ln1_b_ref[l])

        # --- feed-forward + residual layernorm ---
        # TODO(synk): HF BERT's default intermediate activation is exact erf-GELU; we use the
        # tanh approximation (EUP-friendly, ~1e-3 relative difference).
        inter = jax.nn.gelu(
            jnp.dot(x, wi_ref[l], preferred_element_type=jnp.float32) + bi_ref[l],
            approximate=True,
        )
        ff = jnp.dot(inter, wf_ref[l], preferred_element_type=jnp.float32) + bf_ref[l]
        x = layernorm(ff + x, ln2_g_ref[l], ln2_b_ref[l])

    # --- pooler: dense + tanh on the [CLS] token (row 0 of each sequence) ---
    cls = jnp.concatenate([x[b * S:b * S + 1, :] for b in range(B)], axis=0)  # [B, HIDDEN]
    pooled = jnp.tanh(
        jnp.dot(cls, pooler_w_ref[...], preferred_element_type=jnp.float32) + pooler_b_ref[...]
    )
    out_ref[...] = pooled


# ----------------------------- jitted forward --------------------------------
@jax.jit
def bert_forward(params, input_ids, attention_mask):
    """input_ids/attention_mask: [F, B, S] (F = number of stacked fields) -> pooled [F, B, HIDDEN]."""
    F, B, S = input_ids.shape

    # Embedding gather is plain-JAX glue (data-dependent gather); token_type_ids default to 0,
    # matching BertModel(input_ids, attention_mask) with no token_type_ids.
    emb = (
        jnp.take(params["word_emb"], input_ids, axis=0)
        + params["pos_emb"][None, None, :S, :]
        + params["type_emb"][None, None, 0:1, :]
    )  # [F, B, S, HIDDEN]
    emb = emb.reshape(F, B * S, HIDDEN).astype(jnp.float32)
    mask = attention_mask.astype(jnp.float32)  # [F, B, S]

    weight_args = (
        params["emb_ln_g"], params["emb_ln_b"],
        params["wqkv"], params["bqkv"], params["wo"], params["bo"],
        params["ln1_g"], params["ln1_b"],
        params["wi"], params["bi"], params["wf"], params["bf"],
        params["ln2_g"], params["ln2_b"],
        params["pooler_w"], params["pooler_b"],
    )

    def full_block(arr):
        # Whole-array block, identical (grid-invariant) for every field: stays resident in VMEM.
        nd = arr.ndim
        return pl.BlockSpec(arr.shape, lambda f, _nd=nd: (0,) * _nd)

    in_specs = (
        [
            pl.BlockSpec((None, B * S, HIDDEN), lambda f: (f, 0, 0)),  # embeddings for field f
            pl.BlockSpec((None, B, S), lambda f: (f, 0, 0)),           # mask for field f
        ]
        + [full_block(w) for w in weight_args]
    )
    out_spec = pl.BlockSpec((None, B, HIDDEN), lambda f: (f, 0, 0))

    pooled = pl.pallas_call(
        _bert_forward_kernel,
        grid=(F,),
        in_specs=in_specs,
        out_specs=out_spec,
        out_shape=jax.ShapeDtypeStruct((F, B, HIDDEN), jnp.float32),
        compiler_params=pltpu.CompilerParams(dimension_semantics=("parallel",)),
    )(emb, mask, *weight_args)
    return pooled


# ----------------------------- parameters ------------------------------------
def init_params(key):
    scale = 0.02

    def nrm(k, shape):
        return scale * jax.random.normal(k, shape, dtype=jnp.float32)

    keys = iter(jax.random.split(key, 8 + LAYERS * 8))
    params = {
        "word_emb": nrm(next(keys), (VOCAB, HIDDEN)),
        "pos_emb": nrm(next(keys), (MAX_POS, HIDDEN)),
        "type_emb": nrm(next(keys), (2, HIDDEN)),
        "emb_ln_g": jnp.ones((1, HIDDEN), jnp.float32),
        "emb_ln_b": jnp.zeros((1, HIDDEN), jnp.float32),
        "pooler_w": nrm(next(keys), (HIDDEN, HIDDEN)),
        "pooler_b": jnp.zeros((1, HIDDEN), jnp.float32),
    }
    # Per-layer weights, stacked along a leading LAYERS axis; QKV pre-fused to [H, 3H].
    wqkv, wo, wi, wf = [], [], [], []
    for _ in range(LAYERS):
        wq = nrm(next(keys), (HIDDEN, HIDDEN))
        wk = nrm(next(keys), (HIDDEN, HIDDEN))
        wv = nrm(next(keys), (HIDDEN, HIDDEN))
        wqkv.append(jnp.concatenate([wq, wk, wv], axis=1))  # [H, 3H]
        wo.append(nrm(next(keys), (HIDDEN, HIDDEN)))
        wi.append(nrm(next(keys), (HIDDEN, INTERMEDIATE)))
        wf.append(nrm(next(keys), (INTERMEDIATE, HIDDEN)))
    params.update(
        {
            "wqkv": jnp.stack(wqkv),                                        # [L, H, 3H]
            "bqkv": jnp.zeros((LAYERS, 1, 3 * HIDDEN), jnp.float32),
            "wo": jnp.stack(wo),                                            # [L, H, H]
            "bo": jnp.zeros((LAYERS, 1, HIDDEN), jnp.float32),
            "ln1_g": jnp.ones((LAYERS, 1, HIDDEN), jnp.float32),
            "ln1_b": jnp.zeros((LAYERS, 1, HIDDEN), jnp.float32),
            "wi": jnp.stack(wi),                                            # [L, H, I]
            "bi": jnp.zeros((LAYERS, 1, INTERMEDIATE), jnp.float32),
            "wf": jnp.stack(wf),                                            # [L, I, H]
            "bf": jnp.zeros((LAYERS, 1, HIDDEN), jnp.float32),
            "ln2_g": jnp.ones((LAYERS, 1, HIDDEN), jnp.float32),
            "ln2_b": jnp.zeros((LAYERS, 1, HIDDEN), jnp.float32),
        }
    )
    return params


# ----------------------------- SimpleRanker -----------------------------------
class SimpleRanker:
    _fields = ["question", "section"]
    _keys = ["input_ids", "attention_mask"]
    _output_vector_name = "vector"

    def __init__(self, params, fields=None, vector_name=None):
        self.params = params
        if fields is not None:
            self._fields = fields
        if vector_name is not None:
            self._output_vector_name = vector_name

    def get_output_shape(self, *args, **kwargs):
        return (HIDDEN,)

    def __call__(self, batch, **kwargs):
        present = []
        for field in self._fields:
            keys = [f"{field}.{key}" for key in self._keys]
            if all(key in batch for key in keys):
                present.append((field, batch[keys[0]], batch[keys[1]]))
        if not present:
            raise ValueError(
                f"Missing keys in batch: fields={self._fields}. Found: {list(batch.keys())}"
            )

        output = {}
        shapes = {tuple(ids.shape) for _, ids, _ in present}
        if len(shapes) == 1:
            # Stack all present fields along a leading axis -> one jitted forward, one pallas_call.
            ids = jnp.stack([jnp.asarray(p[1], jnp.int32) for p in present])
            mask = jnp.stack([jnp.asarray(p[2]) for p in present])
            pooled = bert_forward(self.params, ids, mask)  # [F, B, HIDDEN]
            for i, (field, _, _) in enumerate(present):
                output[f"{field}.{self._output_vector_name}"] = pooled[i]
        else:
            # Fallback: fields with differing shapes run separately (still one fused kernel each).
            for field, ids, mask in present:
                pooled = bert_forward(
                    self.params,
                    jnp.asarray(ids, jnp.int32)[None],
                    jnp.asarray(mask)[None],
                )[0]
                output[f"{field}.{self._output_vector_name}"] = pooled
        return output


# ----------------------------- main -------------------------------------------
if __name__ == "__main__":
    key = jax.random.PRNGKey(0)
    pkey, qkey, skey = jax.random.split(key, 3)
    params = init_params(pkey)

    q_ids = jax.random.randint(qkey, (BATCH, SEQ), 0, VOCAB, dtype=jnp.int32)
    s_ids = jax.random.randint(skey, (BATCH, SEQ), 0, VOCAB, dtype=jnp.int32)
    q_mask = jnp.ones((BATCH, SEQ), jnp.int32).at[:, SEQ - 2:].set(0)
    s_mask = jnp.ones((BATCH, SEQ), jnp.int32)

    batch = {
        "question.input_ids": q_ids,
        "question.attention_mask": q_mask,
        "section.input_ids": s_ids,
        "section.attention_mask": s_mask,
    }

    ranker = SimpleRanker(params)
    out = ranker(batch)

    for k_, v_ in out.items():
        jax.block_until_ready(v_)
        assert v_.shape == (BATCH, HIDDEN), (k_, v_.shape)
        assert bool(jnp.all(jnp.isfinite(v_)))

    print("KERNEL_OK")
</pallas_src>

<mosaic_0001>
module attributes {stable_mosaic.version = 11 : i64} {
  func.func @_bert_forward_kernel(%arg0: i32, %arg1: memref<1x16x32xf32, #tpu.memory_space<vmem>>, %arg2: memref<1x2x8xf32, #tpu.memory_space<vmem>>, %arg3: memref<1x32xf32, #tpu.memory_space<vmem>>, %arg4: memref<1x32xf32, #tpu.memory_space<vmem>>, %arg5: memref<2x32x96xf32, #tpu.memory_space<vmem>>, %arg6: memref<2x1x96xf32, #tpu.memory_space<vmem>>, %arg7: memref<2x32x32xf32, #tpu.memory_space<vmem>>, %arg8: memref<2x1x32xf32, #tpu.memory_space<vmem>>, %arg9: memref<2x1x32xf32, #tpu.memory_space<vmem>>, %arg10: memref<2x1x32xf32, #tpu.memory_space<vmem>>, %arg11: memref<2x32x64xf32, #tpu.memory_space<vmem>>, %arg12: memref<2x1x64xf32, #tpu.memory_space<vmem>>, %arg13: memref<2x64x32xf32, #tpu.memory_space<vmem>>, %arg14: memref<2x1x32xf32, #tpu.memory_space<vmem>>, %arg15: memref<2x1x32xf32, #tpu.memory_space<vmem>>, %arg16: memref<2x1x32xf32, #tpu.memory_space<vmem>>, %arg17: memref<32x32xf32, #tpu.memory_space<vmem>>, %arg18: memref<1x32xf32, #tpu.memory_space<vmem>>, %arg19: memref<1x2x32xf32, #tpu.memory_space<vmem>>) attributes {dimension_semantics = [#tpu.dimension_semantics<parallel>], iteration_bounds = array<i64: 2>, scalar_prefetch = 0 : i64, scratch_operands = 0 : i64, tpu.core_type = #tpu.core_type<tc>, window_params = [{transform_indices = @transform_0, window_bounds = array<i64: 1, 16, 32>}, {transform_indices = @transform_1, window_bounds = array<i64: 1, 2, 8>}, {pipeline_mode = #tpu.pipeline_mode<synchronous>, transform_indices = @transform_2, window_bounds = array<i64: 1, 32>}, {pipeline_mode = #tpu.pipeline_mode<synchronous>, transform_indices = @transform_3, window_bounds = array<i64: 1, 32>}, {pipeline_mode = #tpu.pipeline_mode<synchronous>, transform_indices = @transform_4, window_bounds = array<i64: 2, 32, 96>}, {pipeline_mode = #tpu.pipeline_mode<synchronous>, transform_indices = @transform_5, window_bounds = array<i64: 2, 1, 96>}, {pipeline_mode = #tpu.pipeline_mode<synchronous>, transform_indices = @transform_6, window_bounds = array<i64: 2, 32, 32>}, {pipeline_mode = #tpu.pipeline_mode<synchronous>, transform_indices = @transform_7, window_bounds = array<i64: 2, 1, 32>}, {pipeline_mode = #tpu.pipeline_mode<synchronous>, transform_indices = @transform_8, window_bounds = array<i64: 2, 1, 32>}, {pipeline_mode = #tpu.pipeline_mode<synchronous>, transform_indices = @transform_9, window_bounds = array<i64: 2, 1, 32>}, {pipeline_mode = #tpu.pipeline_mode<synchronous>, transform_indices = @transform_10, window_bounds = array<i64: 2, 32, 64>}, {pipeline_mode = #tpu.pipeline_mode<synchronous>, transform_indices = @transform_11, window_bounds = array<i64: 2, 1, 64>}, {pipeline_mode = #tpu.pipeline_mode<synchronous>, transform_indices = @transform_12, window_bounds = array<i64: 2, 64, 32>}, {pipeline_mode = #tpu.pipeline_mode<synchronous>, transform_indices = @transform_13, window_bounds = array<i64: 2, 1, 32>}, {pipeline_mode = #tpu.pipeline_mode<synchronous>, transform_indices = @transform_14, window_bounds = array<i64: 2, 1, 32>}, {pipeline_mode = #tpu.pipeline_mode<synchronous>, transform_indices = @transform_15, window_bounds = array<i64: 2, 1, 32>}, {pipeline_mode = #tpu.pipeline_mode<synchronous>, transform_indices = @transform_16, window_bounds = array<i64: 32, 32>}, {pipeline_mode = #tpu.pipeline_mode<synchronous>, transform_indices = @transform_17, window_bounds = array<i64: 1, 32>}, {transform_indices = @transform_18, window_bounds = array<i64: 1, 2, 32>}]} {
    %c0 = arith.constant 0 : index
    %c0_0 = arith.constant 0 : index
    %c0_1 = arith.constant 0 : index
    %0 = vector.load %arg2[%c0, %c0_0, %c0_1] : memref<1x2x8xf32, #tpu.memory_space<vmem>>, vector<1x2x8xf32>
    %1 = vector.shape_cast %0 : vector<1x2x8xf32> to vector<2x8xf32>
    %cst = arith.constant 1.000000e+00 : f32
    %2 = vector.broadcast %cst : f32 to vector<2x8xf32>
    %3 = arith.subf %2, %1 : vector<2x8xf32>
    %cst_2 = arith.constant -1.000000e+09 : f32
    %4 = vector.broadcast %cst_2 : f32 to vector<2x8xf32>
    %5 = arith.mulf %3, %4 : vector<2x8xf32>
    %c0_3 = arith.constant 0 : index
    %c0_4 = arith.constant 0 : index
    %c0_5 = arith.constant 0 : index
    %6 = vector.load %arg1[%c0_3, %c0_4, %c0_5] : memref<1x16x32xf32, #tpu.memory_space<vmem>>, vector<1x16x32xf32>
    %7 = vector.shape_cast %6 : vector<1x16x32xf32> to vector<16x32xf32>
    %c0_6 = arith.constant 0 : index
    %c0_7 = arith.constant 0 : index
    %8 = vector.load %arg3[%c0_6, %c0_7] : memref<1x32xf32, #tpu.memory_space<vmem>>, vector<1x32xf32>
    %c0_8 = arith.constant 0 : index
    %c0_9 = arith.constant 0 : index
    %9 = vector.load %arg4[%c0_8, %c0_9] : memref<1x32xf32, #tpu.memory_space<vmem>>, vector<1x32xf32>
    %cst_10 = arith.constant dense<0.000000e+00> : vector<16xf32>
    %10 = vector.multi_reduction <add>, %7, %cst_10 [1] : vector<16x32xf32> to vector<16xf32>
    %11 = vector.shape_cast %10 : vector<16xf32> to vector<16x1xf32>
    %cst_11 = arith.constant 3.200000e+01 : f32
    %12 = vector.broadcast %cst_11 : f32 to vector<16x1xf32>
    %13 = arith.divf %11, %12 : vector<16x1xf32>
    %14 = vector.broadcast %13 : vector<16x1xf32> to vector<16x32xf32>
    %15 = arith.subf %7, %14 : vector<16x32xf32>
    %16 = arith.mulf %15, %15 : vector<16x32xf32>
    %cst_12 = arith.constant dense<0.000000e+00> : vector<16xf32>
    %17 = vector.multi_reduction <add>, %16, %cst_12 [1] : vector<16x32xf32> to vector<16xf32>
    %18 = vector.shape_cast %17 : vector<16xf32> to vector<16x1xf32>
    %cst_13 = arith.constant 3.200000e+01 : f32
    %19 = vector.broadcast %cst_13 : f32 to vector<16x1xf32>
    %20 = arith.divf %18, %19 : vector<16x1xf32>
    %21 = vector.broadcast %13 : vector<16x1xf32> to vector<16x32xf32>
    %22 = arith.subf %7, %21 : vector<16x32xf32>
    %cst_14 = arith.constant 9.99999996E-13 : f32
    %23 = vector.broadcast %cst_14 : f32 to vector<16x1xf32>
    %24 = arith.addf %20, %23 : vector<16x1xf32>
    %25 = math.rsqrt %24 : vector<16x1xf32>
    %26 = vector.broadcast %25 : vector<16x1xf32> to vector<16x32xf32>
    %27 = arith.mulf %22, %26 : vector<16x32xf32>
    %28 = vector.broadcast %8 : vector<1x32xf32> to vector<16x32xf32>
    %29 = arith.mulf %27, %28 : vector<16x32xf32>
    %30 = vector.broadcast %9 : vector<1x32xf32> to vector<16x32xf32>
    %31 = arith.addf %29, %30 : vector<16x32xf32>
    %cst_15 = arith.constant 1.600000e+01 : f32
    %32 = math.sqrt %cst_15 : f32
    %cst_16 = arith.constant 1.000000e+00 : f32
    %33 = arith.divf %cst_16, %32 : f32
    %c0_17 = arith.constant 0 : index
    %c0_18 = arith.constant 0 : index
    %c0_19 = arith.constant 0 : index
    %34 = vector.load %arg5[%c0_17, %c0_18, %c0_19] : memref<2x32x96xf32, #tpu.memory_space<vmem>>, vector<1x32x96xf32>
    %35 = vector.shape_cast %34 : vector<1x32x96xf32> to vector<32x96xf32>
    %cst_20 = arith.constant dense<0.000000e+00> : vector<16x96xf32>
    %36 = tpu.matmul %31, %35, %cst_20 {dimension_numbers = #tpu.dot_dimension_numbers<[1], [0], [0], [1], [0, 0, 1, 1], [], []>} : vector<16x32xf32>, vector<32x96xf32>, vector<16x96xf32> -> vector<16x96xf32>
    %c0_21 = arith.constant 0 : index
    %c0_22 = arith.constant 0 : index
    %c0_23 = arith.constant 0 : index
    %37 = vector.load %arg6[%c0_21, %c0_22, %c0_23] : memref<2x1x96xf32, #tpu.memory_space<vmem>>, vector<1x1x96xf32>
    %38 = vector.shape_cast %37 : vector<1x1x96xf32> to vector<1x96xf32>
    %39 = vector.broadcast %38 : vector<1x96xf32> to vector<16x96xf32>
    %40 = arith.addf %36, %39 : vector<16x96xf32>
    %41 = vector.extract_strided_slice %40 {offsets = [0, 0], sizes = [8, 32], strides = [1, 1]} : vector<16x96xf32> to vector<8x32xf32>
    %42 = vector.extract_strided_slice %40 {offsets = [0, 32], sizes = [8, 32], strides = [1, 1]} : vector<16x96xf32> to vector<8x32xf32>
    %43 = vector.extract_strided_slice %40 {offsets = [0, 64], sizes = [8, 32], strides = [1, 1]} : vector<16x96xf32> to vector<8x32xf32>
    %44 = vector.extract_strided_slice %5 {offsets = [0, 0], sizes = [1, 8], strides = [1, 1]} : vector<2x8xf32> to vector<1x8xf32>
    %45 = vector.extract_strided_slice %41 {offsets = [0, 0], sizes = [8, 16], strides = [1, 1]} : vector<8x32xf32> to vector<8x16xf32>
    %46 = vector.extract_strided_slice %42 {offsets = [0, 0], sizes = [8, 16], strides = [1, 1]} : vector<8x32xf32> to vector<8x16xf32>
    %47 = vector.extract_strided_slice %43 {offsets = [0, 0], sizes = [8, 16], strides = [1, 1]} : vector<8x32xf32> to vector<8x16xf32>
    %48 = tpu.transpose %46, [1, 0] : vector<8x16xf32> -> vector<16x8xf32>
    %cst_24 = arith.constant dense<0.000000e+00> : vector<8x8xf32>
    %49 = tpu.matmul %45, %48, %cst_24 {dimension_numbers = #tpu.dot_dimension_numbers<[1], [0], [0], [1], [0, 0, 1, 1], [], []>} : vector<8x16xf32>, vector<16x8xf32>, vector<8x8xf32> -> vector<8x8xf32>
    %50 = vector.broadcast %33 : f32 to vector<8x8xf32>
    %51 = arith.mulf %49, %50 : vector<8x8xf32>
    %52 = vector.broadcast %44 : vector<1x8xf32> to vector<8x8xf32>
    %53 = arith.addf %51, %52 : vector<8x8xf32>
    %cst_25 = arith.constant dense<0xFF800000> : vector<8xf32>
    %54 = vector.multi_reduction <maximumf>, %53, %cst_25 [1] : vector<8x8xf32> to vector<8xf32>
    %55 = vector.shape_cast %54 : vector<8xf32> to vector<8x1xf32>
    %56 = vector.broadcast %55 : vector<8x1xf32> to vector<8x8xf32>
    %57 = arith.subf %53, %56 : vector<8x8xf32>
    %58 = math.exp %57 : vector<8x8xf32>
    %cst_26 = arith.constant dense<0.000000e+00> : vector<8xf32>
    %59 = vector.multi_reduction <add>, %58, %cst_26 [1] : vector<8x8xf32> to vector<8xf32>
    %60 = vector.shape_cast %59 : vector<8xf32> to vector<8x1xf32>
    %61 = vector.broadcast %60 : vector<8x1xf32> to vector<8x8xf32>
    %62 = arith.divf %58, %61 : vector<8x8xf32>
    %cst_27 = arith.constant dense<0.000000e+00> : vector<8x16xf32>
    %63 = tpu.matmul %62, %47, %cst_27 {dimension_numbers = #tpu.dot_dimension_numbers<[1], [0], [0], [1], [0, 0, 1, 1], [], []>} : vector<8x8xf32>, vector<8x16xf32>, vector<8x16xf32> -> vector<8x16xf32>
    %64 = vector.extract_strided_slice %41 {offsets = [0, 16], sizes = [8, 16], strides = [1, 1]} : vector<8x32xf32> to vector<8x16xf32>
    %65 = vector.extract_strided_slice %42 {offsets = [0, 16], sizes = [8, 16], strides = [1, 1]} : vector<8x32xf32> to vector<8x16xf32>
    %66 = vector.extract_strided_slice %43 {offsets = [0, 16], sizes = [8, 16], strides = [1, 1]} : vector<8x32xf32> to vector<8x16xf32>
    %67 = tpu.transpose %65, [1, 0] : vector<8x16xf32> -> vector<16x8xf32>
    %cst_28 = arith.constant dense<0.000000e+00> : vector<8x8xf32>
    %68 = tpu.matmul %64, %67, %cst_28 {dimension_numbers = #tpu.dot_dimension_numbers<[1], [0], [0], [1], [0, 0, 1, 1], [], []>} : vector<8x16xf32>, vector<16x8xf32>, vector<8x8xf32> -> vector<8x8xf32>
    %69 = vector.broadcast %33 : f32 to vector<8x8xf32>
    %70 = arith.mulf %68, %69 : vector<8x8xf32>
    %71 = vector.broadcast %44 : vector<1x8xf32> to vector<8x8xf32>
    %72 = arith.addf %70, %71 : vector<8x8xf32>
    %cst_29 = arith.constant dense<0xFF800000> : vector<8xf32>
    %73 = vector.multi_reduction <maximumf>, %72, %cst_29 [1] : vector<8x8xf32> to vector<8xf32>
    %74 = vector.shape_cast %73 : vector<8xf32> to vector<8x1xf32>
    %75 = vector.broadcast %74 : vector<8x1xf32> to vector<8x8xf32>
    %76 = arith.subf %72, %75 : vector<8x8xf32>
    %77 = math.exp %76 : vector<8x8xf32>
    %cst_30 = arith.constant dense<0.000000e+00> : vector<8xf32>
    %78 = vector.multi_reduction <add>, %77, %cst_30 [1] : vector<8x8xf32> to vector<8xf32>
    %79 = vector.shape_cast %78 : vector<8xf32> to vector<8x1xf32>
    %80 = vector.broadcast %79 : vector<8x1xf32> to vector<8x8xf32>
    %81 = arith.divf %77, %80 : vector<8x8xf32>
    %cst_31 = arith.constant dense<0.000000e+00> : vector<8x16xf32>
    %82 = tpu.matmul %81, %66, %cst_31 {dimension_numbers = #tpu.dot_dimension_numbers<[1], [0], [0], [1], [0, 0, 1, 1], [], []>} : vector<8x8xf32>, vector<8x16xf32>, vector<8x16xf32> -> vector<8x16xf32>
    %83 = tpu.concatenate %63, %82 in 1 : vector<8x16xf32>, vector<8x16xf32> -> vector<8x32xf32>
    %84 = vector.extract_strided_slice %40 {offsets = [8, 0], sizes = [8, 32], strides = [1, 1]} : vector<16x96xf32> to vector<8x32xf32>
    %85 = vector.extract_strided_slice %40 {offsets = [8, 32], sizes = [8, 32], strides = [1, 1]} : vector<16x96xf32> to vector<8x32xf32>
    %86 = vector.extract_strided_slice %40 {offsets = [8, 64], sizes = [8, 32], strides = [1, 1]} : vector<16x96xf32> to vector<8x32xf32>
    %87 = vector.extract_strided_slice %5 {offsets = [1, 0], sizes = [1, 8], strides = [1, 1]} : vector<2x8xf32> to vector<1x8xf32>
    %88 = vector.extract_strided_slice %84 {offsets = [0, 0], sizes = [8, 16], strides = [1, 1]} : vector<8x32xf32> to vector<8x16xf32>
    %89 = vector.extract_strided_slice %85 {offsets = [0, 0], sizes = [8, 16], strides = [1, 1]} : vector<8x32xf32> to vector<8x16xf32>
    %90 = vector.extract_strided_slice %86 {offsets = [0, 0], sizes = [8, 16], strides = [1, 1]} : vector<8x32xf32> to vector<8x16xf32>
    %91 = tpu.transpose %89, [1, 0] : vector<8x16xf32> -> vector<16x8xf32>
    %cst_32 = arith.constant dense<0.000000e+00> : vector<8x8xf32>
    %92 = tpu.matmul %88, %91, %cst_32 {dimension_numbers = #tpu.dot_dimension_numbers<[1], [0], [0], [1], [0, 0, 1, 1], [], []>} : vector<8x16xf32>, vector<16x8xf32>, vector<8x8xf32> -> vector<8x8xf32>
    %93 = vector.broadcast %33 : f32 to vector<8x8xf32>
    %94 = arith.mulf %92, %93 : vector<8x8xf32>
    %95 = vector.broadcast %87 : vector<1x8xf32> to vector<8x8xf32>
    %96 = arith.addf %94, %95 : vector<8x8xf32>
    %cst_33 = arith.constant dense<0xFF800000> : vector<8xf32>
    %97 = vector.multi_reduction <maximumf>, %96, %cst_33 [1] : vector<8x8xf32> to vector<8xf32>
    %98 = vector.shape_cast %97 : vector<8xf32> to vector<8x1xf32>
    %99 = vector.broadcast %98 : vector<8x1xf32> to vector<8x8xf32>
    %100 = arith.subf %96, %99 : vector<8x8xf32>
    %101 = math.exp %100 : vector<8x8xf32>
    %cst_34 = arith.constant dense<0.000000e+00> : vector<8xf32>
    %102 = vector.multi_reduction <add>, %101, %cst_34 [1] : vector<8x8xf32> to vector<8xf32>
    %103 = vector.shape_cast %102 : vector<8xf32> to vector<8x1xf32>
    %104 = vector.broadcast %103 : vector<8x1xf32> to vector<8x8xf32>
    %105 = arith.divf %101, %104 : vector<8x8xf32>
    %cst_35 = arith.constant dense<0.000000e+00> : vector<8x16xf32>
    %106 = tpu.matmul %105, %90, %cst_35 {dimension_numbers = #tpu.dot_dimension_numbers<[1], [0], [0], [1], [0, 0, 1, 1], [], []>} : vector<8x8xf32>, vector<8x16xf32>, vector<8x16xf32> -> vector<8x16xf32>
    %107 = vector.extract_strided_slice %84 {offsets = [0, 16], sizes = [8, 16], strides = [1, 1]} : vector<8x32xf32> to vector<8x16xf32>
    %108 = vector.extract_strided_slice %85 {offsets = [0, 16], sizes = [8, 16], strides = [1, 1]} : vector<8x32xf32> to vector<8x16xf32>
    %109 = vector.extract_strided_slice %86 {offsets = [0, 16], sizes = [8, 16], strides = [1, 1]} : vector<8x32xf32> to vector<8x16xf32>
    %110 = tpu.transpose %108, [1, 0] : vector<8x16xf32> -> vector<16x8xf32>
    %cst_36 = arith.constant dense<0.000000e+00> : vector<8x8xf32>
    %111 = tpu.matmul %107, %110, %cst_36 {dimension_numbers = #tpu.dot_dimension_numbers<[1], [0], [0], [1], [0, 0, 1, 1], [], []>} : vector<8x16xf32>, vector<16x8xf32>, vector<8x8xf32> -> vector<8x8xf32>
    %112 = vector.broadcast %33 : f32 to vector<8x8xf32>
    %113 = arith.mulf %111, %112 : vector<8x8xf32>
    %114 = vector.broadcast %87 : vector<1x8xf32> to vector<8x8xf32>
    %115 = arith.addf %113, %114 : vector<8x8xf32>
    %cst_37 = arith.constant dense<0xFF800000> : vector<8xf32>
    %116 = vector.multi_reduction <maximumf>, %115, %cst_37 [1] : vector<8x8xf32> to vector<8xf32>
    %117 = vector.shape_cast %116 : vector<8xf32> to vector<8x1xf32>
    %118 = vector.broadcast %117 : vector<8x1xf32> to vector<8x8xf32>
    %119 = arith.subf %115, %118 : vector<8x8xf32>
    %120 = math.exp %119 : vector<8x8xf32>
    %cst_38 = arith.constant dense<0.000000e+00> : vector<8xf32>
    %121 = vector.multi_reduction <add>, %120, %cst_38 [1] : vector<8x8xf32> to vector<8xf32>
    %122 = vector.shape_cast %121 : vector<8xf32> to vector<8x1xf32>
    %123 = vector.broadcast %122 : vector<8x1xf32> to vector<8x8xf32>
    %124 = arith.divf %120, %123 : vector<8x8xf32>
    %cst_39 = arith.constant dense<0.000000e+00> : vector<8x16xf32>
    %125 = tpu.matmul %124, %109, %cst_39 {dimension_numbers = #tpu.dot_dimension_numbers<[1], [0], [0], [1], [0, 0, 1, 1], [], []>} : vector<8x8xf32>, vector<8x16xf32>, vector<8x16xf32> -> vector<8x16xf32>
    %126 = tpu.concatenate %106, %125 in 1 : vector<8x16xf32>, vector<8x16xf32> -> vector<8x32xf32>
    %127 = tpu.concatenate %83, %126 in 0 : vector<8x32xf32>, vector<8x32xf32> -> vector<16x32xf32>
    %c0_40 = arith.constant 0 : index
    %c0_41 = arith.constant 0 : index
    %c0_42 = arith.constant 0 : index
    %128 = vector.load %arg7[%c0_40, %c0_41, %c0_42] : memref<2x32x32xf32, #tpu.memory_space<vmem>>, vector<1x32x32xf32>
    %129 = vector.shape_cast %128 : vector<1x32x32xf32> to vector<32x32xf32>
    %cst_43 = arith.constant dense<0.000000e+00> : vector<16x32xf32>
    %130 = tpu.matmul %127, %129, %cst_43 {dimension_numbers = #tpu.dot_dimension_numbers<[1], [0], [0], [1], [0, 0, 1, 1], [], []>} : vector<16x32xf32>, vector<32x32xf32>, vector<16x32xf32> -> vector<16x32xf32>
    %c0_44 = arith.constant 0 : index
    %c0_45 = arith.constant 0 : index
    %c0_46 = arith.constant 0 : index
    %131 = vector.load %arg8[%c0_44, %c0_45, %c0_46] : memref<2x1x32xf32, #tpu.memory_space<vmem>>, vector<1x1x32xf32>
    %132 = vector.shape_cast %131 : vector<1x1x32xf32> to vector<1x32xf32>
    %133 = vector.broadcast %132 : vector<1x32xf32> to vector<16x32xf32>
    %134 = arith.addf %130, %133 : vector<16x32xf32>
    %135 = arith.addf %134, %31 : vector<16x32xf32>
    %c0_47 = arith.constant 0 : index
    %c0_48 = arith.constant 0 : index
    %c0_49 = arith.constant 0 : index
    %136 = vector.load %arg9[%c0_47, %c0_48, %c0_49] : memref<2x1x32xf32, #tpu.memory_space<vmem>>, vector<1x1x32xf32>
    %137 = vector.shape_cast %136 : vector<1x1x32xf32> to vector<1x32xf32>
    %c0_50 = arith.constant 0 : index
    %c0_51 = arith.constant 0 : index
    %c0_52 = arith.constant 0 : index
    %138 = vector.load %arg10[%c0_50, %c0_51, %c0_52] : memref<2x1x32xf32, #tpu.memory_space<vmem>>, vector<1x1x32xf32>
    %139 = vector.shape_cast %138 : vector<1x1x32xf32> to vector<1x32xf32>
    %cst_53 = arith.constant dense<0.000000e+00> : vector<16xf32>
    %140 = vector.multi_reduction <add>, %135, %cst_53 [1] : vector<16x32xf32> to vector<16xf32>
    %141 = vector.shape_cast %140 : vector<16xf32> to vector<16x1xf32>
    %cst_54 = arith.constant 3.200000e+01 : f32
    %142 = vector.broadcast %cst_54 : f32 to vector<16x1xf32>
    %143 = arith.divf %141, %142 : vector<16x1xf32>
    %144 = vector.broadcast %143 : vector<16x1xf32> to vector<16x32xf32>
    %145 = arith.subf %135, %144 : vector<16x32xf32>
    %146 = arith.mulf %145, %145 : vector<16x32xf32>
    %cst_55 = arith.constant dense<0.000000e+00> : vector<16xf32>
    %147 = vector.multi_reduction <add>, %146, %cst_55 [1] : vector<16x32xf32> to vector<16xf32>
    %148 = vector.shape_cast %147 : vector<16xf32> to vector<16x1xf32>
    %cst_56 = arith.constant 3.200000e+01 : f32
    %149 = vector.broadcast %cst_56 : f32 to vector<16x1xf32>
    %150 = arith.divf %148, %149 : vector<16x1xf32>
    %151 = vector.broadcast %143 : vector<16x1xf32> to vector<16x32xf32>
    %152 = arith.subf %135, %151 : vector<16x32xf32>
    %cst_57 = arith.constant 9.99999996E-13 : f32
    %153 = vector.broadcast %cst_57 : f32 to vector<16x1xf32>
    %154 = arith.addf %150, %153 : vector<16x1xf32>
    %155 = math.rsqrt %154 : vector<16x1xf32>
    %156 = vector.broadcast %155 : vector<16x1xf32> to vector<16x32xf32>
    %157 = arith.mulf %152, %156 : vector<16x32xf32>
    %158 = vector.broadcast %137 : vector<1x32xf32> to vector<16x32xf32>
    %159 = arith.mulf %157, %158 : vector<16x32xf32>
    %160 = vector.broadcast %139 : vector<1x32xf32> to vector<16x32xf32>
    %161 = arith.addf %159, %160 : vector<16x32xf32>
    %c0_58 = arith.constant 0 : index
    %c0_59 = arith.constant 0 : index
    %c0_60 = arith.constant 0 : index
    %162 = vector.load %arg11[%c0_58, %c0_59, %c0_60] : memref<2x32x64xf32, #tpu.memory_space<vmem>>, vector<1x32x64xf32>
    %163 = vector.shape_cast %162 : vector<1x32x64xf32> to vector<32x64xf32>
    %cst_61 = arith.constant dense<0.000000e+00> : vector<16x64xf32>
    %164 = tpu.matmul %161, %163, %cst_61 {dimension_numbers = #tpu.dot_dimension_numbers<[1], [0], [0], [1], [0, 0, 1, 1], [], []>} : vector<16x32xf32>, vector<32x64xf32>, vector<16x64xf32> -> vector<16x64xf32>
    %c0_62 = arith.constant 0 : index
    %c0_63 = arith.constant 0 : index
    %c0_64 = arith.constant 0 : index
    %165 = vector.load %arg12[%c0_62, %c0_63, %c0_64] : memref<2x1x64xf32, #tpu.memory_space<vmem>>, vector<1x1x64xf32>
    %166 = vector.shape_cast %165 : vector<1x1x64xf32> to vector<1x64xf32>
    %167 = vector.broadcast %166 : vector<1x64xf32> to vector<16x64xf32>
    %168 = arith.addf %164, %167 : vector<16x64xf32>
    %169 = arith.mulf %168, %168 : vector<16x64xf32>
    %170 = arith.mulf %168, %169 : vector<16x64xf32>
    %cst_65 = arith.constant 4.471500e-02 : f32
    %171 = vector.broadcast %cst_65 : f32 to vector<16x64xf32>
    %172 = arith.mulf %171, %170 : vector<16x64xf32>
    %173 = arith.addf %168, %172 : vector<16x64xf32>
    %cst_66 = arith.constant 0.797884583 : f32
    %174 = vector.broadcast %cst_66 : f32 to vector<16x64xf32>
    %175 = arith.mulf %174, %173 : vector<16x64xf32>
    %176 = math.tanh %175 : vector<16x64xf32>
    %cst_67 = arith.constant 1.000000e+00 : f32
    %177 = vector.broadcast %cst_67 : f32 to vector<16x64xf32>
    %178 = arith.addf %177, %176 : vector<16x64xf32>
    %cst_68 = arith.constant 5.000000e-01 : f32
    %179 = vector.broadcast %cst_68 : f32 to vector<16x64xf32>
    %180 = arith.mulf %179, %178 : vector<16x64xf32>
    %181 = arith.mulf %168, %180 : vector<16x64xf32>
    %c0_69 = arith.constant 0 : index
    %c0_70 = arith.constant 0 : index
    %c0_71 = arith.constant 0 : index
    %182 = vector.load %arg13[%c0_69, %c0_70, %c0_71] : memref<2x64x32xf32, #tpu.memory_space<vmem>>, vector<1x64x32xf32>
    %183 = vector.shape_cast %182 : vector<1x64x32xf32> to vector<64x32xf32>
    %cst_72 = arith.constant dense<0.000000e+00> : vector<16x32xf32>
    %184 = tpu.matmul %181, %183, %cst_72 {dimension_numbers = #tpu.dot_dimension_numbers<[1], [0], [0], [1], [0, 0, 1, 1], [], []>} : vector<16x64xf32>, vector<64x32xf32>, vector<16x32xf32> -> vector<16x32xf32>
    %c0_73 = arith.constant 0 : index
    %c0_74 = arith.constant 0 : index
    %c0_75 = arith.constant 0 : index
    %185 = vector.load %arg14[%c0_73, %c0_74, %c0_75] : memref<2x1x32xf32, #tpu.memory_space<vmem>>, vector<1x1x32xf32>
    %186 = vector.shape_cast %185 : vector<1x1x32xf32> to vector<1x32xf32>
    %187 = vector.broadcast %186 : vector<1x32xf32> to vector<16x32xf32>
    %188 = arith.addf %184, %187 : vector<16x32xf32>
    %189 = arith.addf %188, %161 : vector<16x32xf32>
    %c0_76 = arith.constant 0 : index
    %c0_77 = arith.constant 0 : index
    %c0_78 = arith.constant 0 : index
    %190 = vector.load %arg15[%c0_76, %c0_77, %c0_78] : memref<2x1x32xf32, #tpu.memory_space<vmem>>, vector<1x1x32xf32>
    %191 = vector.shape_cast %190 : vector<1x1x32xf32> to vector<1x32xf32>
    %c0_79 = arith.constant 0 : index
    %c0_80 = arith.constant 0 : index
    %c0_81 = arith.constant 0 : index
    %192 = vector.load %arg16[%c0_79, %c0_80, %c0_81] : memref<2x1x32xf32, #tpu.memory_space<vmem>>, vector<1x1x32xf32>
    %193 = vector.shape_cast %192 : vector<1x1x32xf32> to vector<1x32xf32>
    %cst_82 = arith.constant dense<0.000000e+00> : vector<16xf32>
    %194 = vector.multi_reduction <add>, %189, %cst_82 [1] : vector<16x32xf32> to vector<16xf32>
    %195 = vector.shape_cast %194 : vector<16xf32> to vector<16x1xf32>
    %cst_83 = arith.constant 3.200000e+01 : f32
    %196 = vector.broadcast %cst_83 : f32 to vector<16x1xf32>
    %197 = arith.divf %195, %196 : vector<16x1xf32>
    %198 = vector.broadcast %197 : vector<16x1xf32> to vector<16x32xf32>
    %199 = arith.subf %189, %198 : vector<16x32xf32>
    %200 = arith.mulf %199, %199 : vector<16x32xf32>
    %cst_84 = arith.constant dense<0.000000e+00> : vector<16xf32>
    %201 = vector.multi_reduction <add>, %200, %cst_84 [1] : vector<16x32xf32> to vector<16xf32>
    %202 = vector.shape_cast %201 : vector<16xf32> to vector<16x1xf32>
    %cst_85 = arith.constant 3.200000e+01 : f32
    %203 = vector.broadcast %cst_85 : f32 to vector<16x1xf32>
    %204 = arith.divf %202, %203 : vector<16x1xf32>
    %205 = vector.broadcast %197 : vector<16x1xf32> to vector<16x32xf32>
    %206 = arith.subf %189, %205 : vector<16x32xf32>
    %cst_86 = arith.constant 9.99999996E-13 : f32
    %207 = vector.broadcast %cst_86 : f32 to vector<16x1xf32>
    %208 = arith.addf %204, %207 : vector<16x1xf32>
    %209 = math.rsqrt %208 : vector<16x1xf32>
    %210 = vector.broadcast %209 : vector<16x1xf32> to vector<16x32xf32>
    %211 = arith.mulf %206, %210 : vector<16x32xf32>
    %212 = vector.broadcast %191 : vector<1x32xf32> to vector<16x32xf32>
    %213 = arith.mulf %211, %212 : vector<16x32xf32>
    %214 = vector.broadcast %193 : vector<1x32xf32> to vector<16x32xf32>
    %215 = arith.addf %213, %214 : vector<16x32xf32>
    %c1 = arith.constant 1 : index
    %c0_87 = arith.constant 0 : index
    %c0_88 = arith.constant 0 : index
    %216 = vector.load %arg5[%c1, %c0_87, %c0_88] : memref<2x32x96xf32, #tpu.memory_space<vmem>>, vector<1x32x96xf32>
    %217 = vector.shape_cast %216 : vector<1x32x96xf32> to vector<32x96xf32>
    %cst_89 = arith.constant dense<0.000000e+00> : vector<16x96xf32>
    %218 = tpu.matmul %215, %217, %cst_89 {dimension_numbers = #tpu.dot_dimension_numbers<[1], [0], [0], [1], [0, 0, 1, 1], [], []>} : vector<16x32xf32>, vector<32x96xf32>, vector<16x96xf32> -> vector<16x96xf32>
    %c1_90 = arith.constant 1 : index
    %c0_91 = arith.constant 0 : index
    %c0_92 = arith.constant 0 : index
    %219 = vector.load %arg6[%c1_90, %c0_91, %c0_92] : memref<2x1x96xf32, #tpu.memory_space<vmem>>, vector<1x1x96xf32>
    %220 = vector.shape_cast %219 : vector<1x1x96xf32> to vector<1x96xf32>
    %221 = vector.broadcast %220 : vector<1x96xf32> to vector<16x96xf32>
    %222 = arith.addf %218, %221 : vector<16x96xf32>
    %223 = vector.extract_strided_slice %222 {offsets = [0, 0], sizes = [8, 32], strides = [1, 1]} : vector<16x96xf32> to vector<8x32xf32>
    %224 = vector.extract_strided_slice %222 {offsets = [0, 32], sizes = [8, 32], strides = [1, 1]} : vector<16x96xf32> to vector<8x32xf32>
    %225 = vector.extract_strided_slice %222 {offsets = [0, 64], sizes = [8, 32], strides = [1, 1]} : vector<16x96xf32> to vector<8x32xf32>
    %226 = vector.extract_strided_slice %5 {offsets = [0, 0], sizes = [1, 8], strides = [1, 1]} : vector<2x8xf32> to vector<1x8xf32>
    %227 = vector.extract_strided_slice %223 {offsets = [0, 0], sizes = [8, 16], strides = [1, 1]} : vector<8x32xf32> to vector<8x16xf32>
    %228 = vector.extract_strided_slice %224 {offsets = [0, 0], sizes = [8, 16], strides = [1, 1]} : vector<8x32xf32> to vector<8x16xf32>
    %229 = vector.extract_strided_slice %225 {offsets = [0, 0], sizes = [8, 16], strides = [1, 1]} : vector<8x32xf32> to vector<8x16xf32>
    %230 = tpu.transpose %228, [1, 0] : vector<8x16xf32> -> vector<16x8xf32>
    %cst_93 = arith.constant dense<0.000000e+00> : vector<8x8xf32>
    %231 = tpu.matmul %227, %230, %cst_93 {dimension_numbers = #tpu.dot_dimension_numbers<[1], [0], [0], [1], [0, 0, 1, 1], [], []>} : vector<8x16xf32>, vector<16x8xf32>, vector<8x8xf32> -> vector<8x8xf32>
    %232 = vector.broadcast %33 : f32 to vector<8x8xf32>
    %233 = arith.mulf %231, %232 : vector<8x8xf32>
    %234 = vector.broadcast %226 : vector<1x8xf32> to vector<8x8xf32>
    %235 = arith.addf %233, %234 : vector<8x8xf32>
    %cst_94 = arith.constant dense<0xFF800000> : vector<8xf32>
    %236 = vector.multi_reduction <maximumf>, %235, %cst_94 [1] : vector<8x8xf32> to vector<8xf32>
    %237 = vector.shape_cast %236 : vector<8xf32> to vector<8x1xf32>
    %238 = vector.broadcast %237 : vector<8x1xf32> to vector<8x8xf32>
    %239 = arith.subf %235, %238 : vector<8x8xf32>
    %240 = math.exp %239 : vector<8x8xf32>
    %cst_95 = arith.constant dense<0.000000e+00> : vector<8xf32>
    %241 = vector.multi_reduction <add>, %240, %cst_95 [1] : vector<8x8xf32> to vector<8xf32>
    %242 = vector.shape_cast %241 : vector<8xf32> to vector<8x1xf32>
    %243 = vector.broadcast %242 : vector<8x1xf32> to vector<8x8xf32>
    %244 = arith.divf %240, %243 : vector<8x8xf32>
    %cst_96 = arith.constant dense<0.000000e+00> : vector<8x16xf32>
    %245 = tpu.matmul %244, %229, %cst_96 {dimension_numbers = #tpu.dot_dimension_numbers<[1], [0], [0], [1], [0, 0, 1, 1], [], []>} : vector<8x8xf32>, vector<8x16xf32>, vector<8x16xf32> -> vector<8x16xf32>
    %246 = vector.extract_strided_slice %223 {offsets = [0, 16], sizes = [8, 16], strides = [1, 1]} : vector<8x32xf32> to vector<8x16xf32>
    %247 = vector.extract_strided_slice %224 {offsets = [0, 16], sizes = [8, 16], strides = [1, 1]} : vector<8x32xf32> to vector<8x16xf32>
    %248 = vector.extract_strided_slice %225 {offsets = [0, 16], sizes = [8, 16], strides = [1, 1]} : vector<8x32xf32> to vector<8x16xf32>
    %249 = tpu.transpose %247, [1, 0] : vector<8x16xf32> -> vector<16x8xf32>
    %cst_97 = arith.constant dense<0.000000e+00> : vector<8x8xf32>
    %250 = tpu.matmul %246, %249, %cst_97 {dimension_numbers = #tpu.dot_dimension_numbers<[1], [0], [0], [1], [0, 0, 1, 1], [], []>} : vector<8x16xf32>, vector<16x8xf32>, vector<8x8xf32> -> vector<8x8xf32>
    %251 = vector.broadcast %33 : f32 to vector<8x8xf32>
    %252 = arith.mulf %250, %251 : vector<8x8xf32>
    %253 = vector.broadcast %226 : vector<1x8xf32> to vector<8x8xf32>
    %254 = arith.addf %252, %253 : vector<8x8xf32>
    %cst_98 = arith.constant dense<0xFF800000> : vector<8xf32>
    %255 = vector.multi_reduction <maximumf>, %254, %cst_98 [1] : vector<8x8xf32> to vector<8xf32>
    %256 = vector.shape_cast %255 : vector<8xf32> to vector<8x1xf32>
    %257 = vector.broadcast %256 : vector<8x1xf32> to vector<8x8xf32>
    %258 = arith.subf %254, %257 : vector<8x8xf32>
    %259 = math.exp %258 : vector<8x8xf32>
    %cst_99 = arith.constant dense<0.000000e+00> : vector<8xf32>
    %260 = vector.multi_reduction <add>, %259, %cst_99 [1] : vector<8x8xf32> to vector<8xf32>
    %261 = vector.shape_cast %260 : vector<8xf32> to vector<8x1xf32>
    %262 = vector.broadcast %261 : vector<8x1xf32> to vector<8x8xf32>
    %263 = arith.divf %259, %262 : vector<8x8xf32>
    %cst_100 = arith.constant dense<0.000000e+00> : vector<8x16xf32>
    %264 = tpu.matmul %263, %248, %cst_100 {dimension_numbers = #tpu.dot_dimension_numbers<[1], [0], [0], [1], [0, 0, 1, 1], [], []>} : vector<8x8xf32>, vector<8x16xf32>, vector<8x16xf32> -> vector<8x16xf32>
    %265 = tpu.concatenate %245, %264 in 1 : vector<8x16xf32>, vector<8x16xf32> -> vector<8x32xf32>
    %266 = vector.extract_strided_slice %222 {offsets = [8, 0], sizes = [8, 32], strides = [1, 1]} : vector<16x96xf32> to vector<8x32xf32>
    %267 = vector.extract_strided_slice %222 {offsets = [8, 32], sizes = [8, 32], strides = [1, 1]} : vector<16x96xf32> to vector<8x32xf32>
    %268 = vector.extract_strided_slice %222 {offsets = [8, 64], sizes = [8, 32], strides = [1, 1]} : vector<16x96xf32> to vector<8x32xf32>
    %269 = vector.extract_strided_slice %5 {offsets = [1, 0], sizes = [1, 8], strides = [1, 1]} : vector<2x8xf32> to vector<1x8xf32>
    %270 = vector.extract_strided_slice %266 {offsets = [0, 0], sizes = [8, 16], strides = [1, 1]} : vector<8x32xf32> to vector<8x16xf32>
    %271 = vector.extract_strided_slice %267 {offsets = [0, 0], sizes = [8, 16], strides = [1, 1]} : vector<8x32xf32> to vector<8x16xf32>
    %272 = vector.extract_strided_slice %268 {offsets = [0, 0], sizes = [8, 16], strides = [1, 1]} : vector<8x32xf32> to vector<8x16xf32>
    %273 = tpu.transpose %271, [1, 0] : vector<8x16xf32> -> vector<16x8xf32>
    %cst_101 = arith.constant dense<0.000000e+00> : vector<8x8xf32>
    %274 = tpu.matmul %270, %273, %cst_101 {dimension_numbers = #tpu.dot_dimension_numbers<[1], [0], [0], [1], [0, 0, 1, 1], [], []>} : vector<8x16xf32>, vector<16x8xf32>, vector<8x8xf32> -> vector<8x8xf32>
    %275 = vector.broadcast %33 : f32 to vector<8x8xf32>
    %276 = arith.mulf %274, %275 : vector<8x8xf32>
    %277 = vector.broadcast %269 : vector<1x8xf32> to vector<8x8xf32>
    %278 = arith.addf %276, %277 : vector<8x8xf32>
    %cst_102 = arith.constant dense<0xFF800000> : vector<8xf32>
    %279 = vector.multi_reduction <maximumf>, %278, %cst_102 [1] : vector<8x8xf32> to vector<8xf32>
    %280 = vector.shape_cast %279 : vector<8xf32> to vector<8x1xf32>
    %281 = vector.broadcast %280 : vector<8x1xf32> to vector<8x8xf32>
    %282 = arith.subf %278, %281 : vector<8x8xf32>
    %283 = math.exp %282 : vector<8x8xf32>
    %cst_103 = arith.constant dense<0.000000e+00> : vector<8xf32>
    %284 = vector.multi_reduction <add>, %283, %cst_103 [1] : vector<8x8xf32> to vector<8xf32>
    %285 = vector.shape_cast %284 : vector<8xf32> to vector<8x1xf32>
    %286 = vector.broadcast %285 : vector<8x1xf32> to vector<8x8xf32>
    %287 = arith.divf %283, %286 : vector<8x8xf32>
    %cst_104 = arith.constant dense<0.000000e+00> : vector<8x16xf32>
    %288 = tpu.matmul %287, %272, %cst_104 {dimension_numbers = #tpu.dot_dimension_numbers<[1], [0], [0], [1], [0, 0, 1, 1], [], []>} : vector<8x8xf32>, vector<8x16xf32>, vector<8x16xf32> -> vector<8x16xf32>
    %289 = vector.extract_strided_slice %266 {offsets = [0, 16], sizes = [8, 16], strides = [1, 1]} : vector<8x32xf32> to vector<8x16xf32>
    %290 = vector.extract_strided_slice %267 {offsets = [0, 16], sizes = [8, 16], strides = [1, 1]} : vector<8x32xf32> to vector<8x16xf32>
    %291 = vector.extract_strided_slice %268 {offsets = [0, 16], sizes = [8, 16], strides = [1, 1]} : vector<8x32xf32> to vector<8x16xf32>
    %292 = tpu.transpose %290, [1, 0] : vector<8x16xf32> -> vector<16x8xf32>
    %cst_105 = arith.constant dense<0.000000e+00> : vector<8x8xf32>
    %293 = tpu.matmul %289, %292, %cst_105 {dimension_numbers = #tpu.dot_dimension_numbers<[1], [0], [0], [1], [0, 0, 1, 1], [], []>} : vector<8x16xf32>, vector<16x8xf32>, vector<8x8xf32> -> vector<8x8xf32>
    %294 = vector.broadcast %33 : f32 to vector<8x8xf32>
    %295 = arith.mulf %293, %294 : vector<8x8xf32>
    %296 = vector.broadcast %269 : vector<1x8xf32> to vector<8x8xf32>
    %297 = arith.addf %295, %296 : vector<8x8xf32>
    %cst_106 = arith.constant dense<0xFF800000> : vector<8xf32>
    %298 = vector.multi_reduction <maximumf>, %297, %cst_106 [1] : vector<8x8xf32> to vector<8xf32>
    %299 = vector.shape_cast %298 : vector<8xf32> to vector<8x1xf32>
    %300 = vector.broadcast %299 : vector<8x1xf32> to vector<8x8xf32>
    %301 = arith.subf %297, %300 : vector<8x8xf32>
    %302 = math.exp %301 : vector<8x8xf32>
    %cst_107 = arith.constant dense<0.000000e+00> : vector<8xf32>
    %303 = vector.multi_reduction <add>, %302, %cst_107 [1] : vector<8x8xf32> to vector<8xf32>
    %304 = vector.shape_cast %303 : vector<8xf32> to vector<8x1xf32>
    %305 = vector.broadcast %304 : vector<8x1xf32> to vector<8x8xf32>
    %306 = arith.divf %302, %305 : vector<8x8xf32>
    %cst_108 = arith.constant dense<0.000000e+00> : vector<8x16xf32>
    %307 = tpu.matmul %306, %291, %cst_108 {dimension_numbers = #tpu.dot_dimension_numbers<[1], [0], [0], [1], [0, 0, 1, 1], [], []>} : vector<8x8xf32>, vector<8x16xf32>, vector<8x16xf32> -> vector<8x16xf32>
    %308 = tpu.concatenate %288, %307 in 1 : vector<8x16xf32>, vector<8x16xf32> -> vector<8x32xf32>
    %309 = tpu.concatenate %265, %308 in 0 : vector<8x32xf32>, vector<8x32xf32> -> vector<16x32xf32>
    %c1_109 = arith.constant 1 : index
    %c0_110 = arith.constant 0 : index
    %c0_111 = arith.constant 0 : index
    %310 = vector.load %arg7[%c1_109, %c0_110, %c0_111] : memref<2x32x32xf32, #tpu.memory_space<vmem>>, vector<1x32x32xf32>
    %311 = vector.shape_cast %310 : vector<1x32x32xf32> to vector<32x32xf32>
    %cst_112 = arith.constant dense<0.000000e+00> : vector<16x32xf32>
    %312 = tpu.matmul %309, %311, %cst_112 {dimension_numbers = #tpu.dot_dimension_numbers<[1], [0], [0], [1], [0, 0, 1, 1], [], []>} : vector<16x32xf32>, vector<32x32xf32>, vector<16x32xf32> -> vector<16x32xf32>
    %c1_113 = arith.constant 1 : index
    %c0_114 = arith.constant 0 : index
    %c0_115 = arith.constant 0 : index
    %313 = vector.load %arg8[%c1_113, %c0_114, %c0_115] : memref<2x1x32xf32, #tpu.memory_space<vmem>>, vector<1x1x32xf32>
    %314 = vector.shape_cast %313 : vector<1x1x32xf32> to vector<1x32xf32>
    %315 = vector.broadcast %314 : vector<1x32xf32> to vector<16x32xf32>
    %316 = arith.addf %312, %315 : vector<16x32xf32>
    %317 = arith.addf %316, %215 : vector<16x32xf32>
    %c1_116 = arith.constant 1 : index
    %c0_117 = arith.constant 0 : index
    %c0_118 = arith.constant 0 : index
    %318 = vector.load %arg9[%c1_116, %c0_117, %c0_118] : memref<2x1x32xf32, #tpu.memory_space<vmem>>, vector<1x1x32xf32>
    %319 = vector.shape_cast %318 : vector<1x1x32xf32> to vector<1x32xf32>
    %c1_119 = arith.constant 1 : index
    %c0_120 = arith.constant 0 : index
    %c0_121 = arith.constant 0 : index
    %320 = vector.load %arg10[%c1_119, %c0_120, %c0_121] : memref<2x1x32xf32, #tpu.memory_space<vmem>>, vector<1x1x32xf32>
    %321 = vector.shape_cast %320 : vector<1x1x32xf32> to vector<1x32xf32>
    %cst_122 = arith.constant dense<0.000000e+00> : vector<16xf32>
    %322 = vector.multi_reduction <add>, %317, %cst_122 [1] : vector<16x32xf32> to vector<16xf32>
    %323 = vector.shape_cast %322 : vector<16xf32> to vector<16x1xf32>
    %cst_123 = arith.constant 3.200000e+01 : f32
    %324 = vector.broadcast %cst_123 : f32 to vector<16x1xf32>
    %325 = arith.divf %323, %324 : vector<16x1xf32>
    %326 = vector.broadcast %325 : vector<16x1xf32> to vector<16x32xf32>
    %327 = arith.subf %317, %326 : vector<16x32xf32>
    %328 = arith.mulf %327, %327 : vector<16x32xf32>
    %cst_124 = arith.constant dense<0.000000e+00> : vector<16xf32>
    %329 = vector.multi_reduction <add>, %328, %cst_124 [1] : vector<16x32xf32> to vector<16xf32>
    %330 = vector.shape_cast %329 : vector<16xf32> to vector<16x1xf32>
    %cst_125 = arith.constant 3.200000e+01 : f32
    %331 = vector.broadcast %cst_125 : f32 to vector<16x1xf32>
    %332 = arith.divf %330, %331 : vector<16x1xf32>
    %333 = vector.broadcast %325 : vector<16x1xf32> to vector<16x32xf32>
    %334 = arith.subf %317, %333 : vector<16x32xf32>
    %cst_126 = arith.constant 9.99999996E-13 : f32
    %335 = vector.broadcast %cst_126 : f32 to vector<16x1xf32>
    %336 = arith.addf %332, %335 : vector<16x1xf32>
    %337 = math.rsqrt %336 : vector<16x1xf32>
    %338 = vector.broadcast %337 : vector<16x1xf32> to vector<16x32xf32>
    %339 = arith.mulf %334, %338 : vector<16x32xf32>
    %340 = vector.broadcast %319 : vector<1x32xf32> to vector<16x32xf32>
    %341 = arith.mulf %339, %340 : vector<16x32xf32>
    %342 = vector.broadcast %321 : vector<1x32xf32> to vector<16x32xf32>
    %343 = arith.addf %341, %342 : vector<16x32xf32>
    %c1_127 = arith.constant 1 : index
    %c0_128 = arith.constant 0 : index
    %c0_129 = arith.constant 0 : index
    %344 = vector.load %arg11[%c1_127, %c0_128, %c0_129] : memref<2x32x64xf32, #tpu.memory_space<vmem>>, vector<1x32x64xf32>
    %345 = vector.shape_cast %344 : vector<1x32x64xf32> to vector<32x64xf32>
    %cst_130 = arith.constant dense<0.000000e+00> : vector<16x64xf32>
    %346 = tpu.matmul %343, %345, %cst_130 {dimension_numbers = #tpu.dot_dimension_numbers<[1], [0], [0], [1], [0, 0, 1, 1], [], []>} : vector<16x32xf32>, vector<32x64xf32>, vector<16x64xf32> -> vector<16x64xf32>
    %c1_131 = arith.constant 1 : index
    %c0_132 = arith.constant 0 : index
    %c0_133 = arith.constant 0 : index
    %347 = vector.load %arg12[%c1_131, %c0_132, %c0_133] : memref<2x1x64xf32, #tpu.memory_space<vmem>>, vector<1x1x64xf32>
    %348 = vector.shape_cast %347 : vector<1x1x64xf32> to vector<1x64xf32>
    %349 = vector.broadcast %348 : vector<1x64xf32> to vector<16x64xf32>
    %350 = arith.addf %346, %349 : vector<16x64xf32>
    %351 = arith.mulf %350, %350 : vector<16x64xf32>
    %352 = arith.mulf %350, %351 : vector<16x64xf32>
    %cst_134 = arith.constant 4.471500e-02 : f32
    %353 = vector.broadcast %cst_134 : f32 to vector<16x64xf32>
    %354 = arith.mulf %353, %352 : vector<16x64xf32>
    %355 = arith.addf %350, %354 : vector<16x64xf32>
    %cst_135 = arith.constant 0.797884583 : f32
    %356 = vector.broadcast %cst_135 : f32 to vector<16x64xf32>
    %357 = arith.mulf %356, %355 : vector<16x64xf32>
    %358 = math.tanh %357 : vector<16x64xf32>
    %cst_136 = arith.constant 1.000000e+00 : f32
    %359 = vector.broadcast %cst_136 : f32 to vector<16x64xf32>
    %360 = arith.addf %359, %358 : vector<16x64xf32>
    %cst_137 = arith.constant 5.000000e-01 : f32
    %361 = vector.broadcast %cst_137 : f32 to vector<16x64xf32>
    %362 = arith.mulf %361, %360 : vector<16x64xf32>
    %363 = arith.mulf %350, %362 : vector<16x64xf32>
    %c1_138 = arith.constant 1 : index
    %c0_139 = arith.constant 0 : index
    %c0_140 = arith.constant 0 : index
    %364 = vector.load %arg13[%c1_138, %c0_139, %c0_140] : memref<2x64x32xf32, #tpu.memory_space<vmem>>, vector<1x64x32xf32>
    %365 = vector.shape_cast %364 : vector<1x64x32xf32> to vector<64x32xf32>
    %cst_141 = arith.constant dense<0.000000e+00> : vector<16x32xf32>
    %366 = tpu.matmul %363, %365, %cst_141 {dimension_numbers = #tpu.dot_dimension_numbers<[1], [0], [0], [1], [0, 0, 1, 1], [], []>} : vector<16x64xf32>, vector<64x32xf32>, vector<16x32xf32> -> vector<16x32xf32>
    %c1_142 = arith.constant 1 : index
    %c0_143 = arith.constant 0 : index
    %c0_144 = arith.constant 0 : index
    %367 = vector.load %arg14[%c1_142, %c0_143, %c0_144] : memref<2x1x32xf32, #tpu.memory_space<vmem>>, vector<1x1x32xf32>
    %368 = vector.shape_cast %367 : vector<1x1x32xf32> to vector<1x32xf32>
    %369 = vector.broadcast %368 : vector<1x32xf32> to vector<16x32xf32>
    %370 = arith.addf %366, %369 : vector<16x32xf32>
    %371 = arith.addf %370, %343 : vector<16x32xf32>
    %c1_145 = arith.constant 1 : index
    %c0_146 = arith.constant 0 : index
    %c0_147 = arith.constant 0 : index
    %372 = vector.load %arg15[%c1_145, %c0_146, %c0_147] : memref<2x1x32xf32, #tpu.memory_space<vmem>>, vector<1x1x32xf32>
    %373 = vector.shape_cast %372 : vector<1x1x32xf32> to vector<1x32xf32>
    %c1_148 = arith.constant 1 : index
    %c0_149 = arith.constant 0 : index
    %c0_150 = arith.constant 0 : index
    %374 = vector.load %arg16[%c1_148, %c0_149, %c0_150] : memref<2x1x32xf32, #tpu.memory_space<vmem>>, vector<1x1x32xf32>
    %375 = vector.shape_cast %374 : vector<1x1x32xf32> to vector<1x32xf32>
    %cst_151 = arith.constant dense<0.000000e+00> : vector<16xf32>
    %376 = vector.multi_reduction <add>, %371, %cst_151 [1] : vector<16x32xf32> to vector<16xf32>
    %377 = vector.shape_cast %376 : vector<16xf32> to vector<16x1xf32>
    %cst_152 = arith.constant 3.200000e+01 : f32
    %378 = vector.broadcast %cst_152 : f32 to vector<16x1xf32>
    %379 = arith.divf %377, %378 : vector<16x1xf32>
    %380 = vector.broadcast %379 : vector<16x1xf32> to vector<16x32xf32>
    %381 = arith.subf %371, %380 : vector<16x32xf32>
    %382 = arith.mulf %381, %381 : vector<16x32xf32>
    %cst_153 = arith.constant dense<0.000000e+00> : vector<16xf32>
    %383 = vector.multi_reduction <add>, %382, %cst_153 [1] : vector<16x32xf32> to vector<16xf32>
    %384 = vector.shape_cast %383 : vector<16xf32> to vector<16x1xf32>
    %cst_154 = arith.constant 3.200000e+01 : f32
    %385 = vector.broadcast %cst_154 : f32 to vector<16x1xf32>
    %386 = arith.divf %384, %385 : vector<16x1xf32>
    %387 = vector.broadcast %379 : vector<16x1xf32> to vector<16x32xf32>
    %388 = arith.subf %371, %387 : vector<16x32xf32>
    %cst_155 = arith.constant 9.99999996E-13 : f32
    %389 = vector.broadcast %cst_155 : f32 to vector<16x1xf32>
    %390 = arith.addf %386, %389 : vector<16x1xf32>
    %391 = math.rsqrt %390 : vector<16x1xf32>
    %392 = vector.broadcast %391 : vector<16x1xf32> to vector<16x32xf32>
    %393 = arith.mulf %388, %392 : vector<16x32xf32>
    %394 = vector.broadcast %373 : vector<1x32xf32> to vector<16x32xf32>
    %395 = arith.mulf %393, %394 : vector<16x32xf32>
    %396 = vector.broadcast %375 : vector<1x32xf32> to vector<16x32xf32>
    %397 = arith.addf %395, %396 : vector<16x32xf32>
    %398 = vector.extract_strided_slice %397 {offsets = [0, 0], sizes = [1, 32], strides = [1, 1]} : vector<16x32xf32> to vector<1x32xf32>
    %399 = vector.extract_strided_slice %397 {offsets = [8, 0], sizes = [1, 32], strides = [1, 1]} : vector<16x32xf32> to vector<1x32xf32>
    %400 = tpu.concatenate %398, %399 in 0 : vector<1x32xf32>, vector<1x32xf32> -> vector<2x32xf32>
    %c0_156 = arith.constant 0 : index
    %c0_157 = arith.constant 0 : index
    %401 = vector.load %arg17[%c0_156, %c0_157] : memref<32x32xf32, #tpu.memory_space<vmem>>, vector<32x32xf32>
    %cst_158 = arith.constant dense<0.000000e+00> : vector<2x32xf32>
    %402 = tpu.matmul %400, %401, %cst_158 {dimension_numbers = #tpu.dot_dimension_numbers<[1], [0], [0], [1], [0, 0, 1, 1], [], []>} : vector<2x32xf32>, vector<32x32xf32>, vector<2x32xf32> -> vector<2x32xf32>
    %c0_159 = arith.constant 0 : index
    %c0_160 = arith.constant 0 : index
    %403 = vector.load %arg18[%c0_159, %c0_160] : memref<1x32xf32, #tpu.memory_space<vmem>>, vector<1x32xf32>
    %404 = vector.broadcast %403 : vector<1x32xf32> to vector<2x32xf32>
    %405 = arith.addf %402, %404 : vector<2x32xf32>
    %406 = math.tanh %405 : vector<2x32xf32>
    %c0_161 = arith.constant 0 : index
    %c0_162 = arith.constant 0 : index
    %c0_163 = arith.constant 0 : index
    %407 = vector.load %arg19[%c0_161, %c0_162, %c0_163] : memref<1x2x32xf32, #tpu.memory_space<vmem>>, vector<1x2x32xf32>
    %408 = vector.shape_cast %407 : vector<1x2x32xf32> to vector<2x32xf32>
    %409 = vector.shape_cast %406 : vector<2x32xf32> to vector<1x2x32xf32>
    tpu.vector_store %arg19[%c0_161, %c0_162, %c0_163], %409 {strides = array<i32>} : memref<1x2x32xf32, #tpu.memory_space<vmem>>, vector<1x2x32xf32>,
    return
  }
  func.func @transform_0(%arg0: i32) -> (i32, i32, i32) {
    %c0_i32 = arith.constant 0 : i32
    %c0_i32_0 = arith.constant 0 : i32
    %c0_i32_1 = arith.constant 0 : i32
    return %arg0, %c0_i32, %c0_i32_0 : i32, i32, i32
  }
  func.func @transform_1(%arg0: i32) -> (i32, i32, i32) {
    %c0_i32 = arith.constant 0 : i32
    %c0_i32_0 = arith.constant 0 : i32
    %c0_i32_1 = arith.constant 0 : i32
    return %arg0, %c0_i32, %c0_i32_0 : i32, i32, i32
  }
  func.func @transform_2(%arg0: i32) -> (i32, i32) {
    %c0_i32 = arith.constant 0 : i32
    %c0_i32_0 = arith.constant 0 : i32
    %c0_i32_1 = arith.constant 0 : i32
    return %c0_i32, %c0_i32_0 : i32, i32
  }
  func.func @transform_3(%arg0: i32) -> (i32, i32) {
    %c0_i32 = arith.constant 0 : i32
    %c0_i32_0 = arith.constant 0 : i32
    %c0_i32_1 = arith.constant 0 : i32
    return %c0_i32, %c0_i32_0 : i32, i32
  }
  func.func @transform_4(%arg0: i32) -> (i32, i32, i32) {
    %c0_i32 = arith.constant 0 : i32
    %c0_i32_0 = arith.constant 0 : i32
    %c0_i32_1 = arith.constant 0 : i32
    %c0_i32_2 = arith.constant 0 : i32
    return %c0_i32, %c0_i32_0, %c0_i32_1 : i32, i32, i32
  }
  func.func @transform_5(%arg0: i32) -> (i32, i32, i32) {
    %c0_i32 = arith.constant 0 : i32
    %c0_i32_0 = arith.constant 0 : i32
    %c0_i32_1 = arith.constant 0 : i32
    %c0_i32_2 = arith.constant 0 : i32
    return %c0_i32, %c0_i32_0, %c0_i32_1 : i32, i32, i32
  }
  func.func @transform_6(%arg0: i32) -> (i32, i32, i32) {
    %c0_i32 = arith.constant 0 : i32
    %c0_i32_0 = arith.constant 0 : i32
    %c0_i32_1 = arith.constant 0 : i32
    %c0_i32_2 = arith.constant 0 : i32
    return %c0_i32, %c0_i32_0, %c0_i32_1 : i32, i32, i32
  }
  func.func @transform_7(%arg0: i32) -> (i32, i32, i32) {
    %c0_i32 = arith.constant 0 : i32
    %c0_i32_0 = arith.constant 0 : i32
    %c0_i32_1 = arith.constant 0 : i32
    %c0_i32_2 = arith.constant 0 : i32
    return %c0_i32, %c0_i32_0, %c0_i32_1 : i32, i32, i32
  }
  func.func @transform_8(%arg0: i32) -> (i32, i32, i32) {
    %c0_i32 = arith.constant 0 : i32
    %c0_i32_0 = arith.constant 0 : i32
    %c0_i32_1 = arith.constant 0 : i32
    %c0_i32_2 = arith.constant 0 : i32
    return %c0_i32, %c0_i32_0, %c0_i32_1 : i32, i32, i32
  }
  func.func @transform_9(%arg0: i32) -> (i32, i32, i32) {
    %c0_i32 = arith.constant 0 : i32
    %c0_i32_0 = arith.constant 0 : i32
    %c0_i32_1 = arith.constant 0 : i32
    %c0_i32_2 = arith.constant 0 : i32
    return %c0_i32, %c0_i32_0, %c0_i32_1 : i32, i32, i32
  }
  func.func @transform_10(%arg0: i32) -> (i32, i32, i32) {
    %c0_i32 = arith.constant 0 : i32
    %c0_i32_0 = arith.constant 0 : i32
    %c0_i32_1 = arith.constant 0 : i32
    %c0_i32_2 = arith.constant 0 : i32
    return %c0_i32, %c0_i32_0, %c0_i32_1 : i32, i32, i32
  }
  func.func @transform_11(%arg0: i32) -> (i32, i32, i32) {
    %c0_i32 = arith.constant 0 : i32
    %c0_i32_0 = arith.constant 0 : i32
    %c0_i32_1 = arith.constant 0 : i32
    %c0_i32_2 = arith.constant 0 : i32
    return %c0_i32, %c0_i32_0, %c0_i32_1 : i32, i32, i32
  }
  func.func @transform_12(%arg0: i32) -> (i32, i32, i32) {
    %c0_i32 = arith.constant 0 : i32
    %c0_i32_0 = arith.constant 0 : i32
    %c0_i32_1 = arith.constant 0 : i32
    %c0_i32_2 = arith.constant 0 : i32
    return %c0_i32, %c0_i32_0, %c0_i32_1 : i32, i32, i32
  }
  func.func @transform_13(%arg0: i32) -> (i32, i32, i32) {
    %c0_i32 = arith.constant 0 : i32
    %c0_i32_0 = arith.constant 0 : i32
    %c0_i32_1 = arith.constant 0 : i32
    %c0_i32_2 = arith.constant 0 : i32
    return %c0_i32, %c0_i32_0, %c0_i32_1 : i32, i32, i32
  }
  func.func @transform_14(%arg0: i32) -> (i32, i32, i32) {
    %c0_i32 = arith.constant 0 : i32
    %c0_i32_0 = arith.constant 0 : i32
    %c0_i32_1 = arith.constant 0 : i32
    %c0_i32_2 = arith.constant 0 : i32
    return %c0_i32, %c0_i32_0, %c0_i32_1 : i32, i32, i32
  }
  func.func @transform_15(%arg0: i32) -> (i32, i32, i32) {
    %c0_i32 = arith.constant 0 : i32
    %c0_i32_0 = arith.constant 0 : i32
    %c0_i32_1 = arith.constant 0 : i32
    %c0_i32_2 = arith.constant 0 : i32
    return %c0_i32, %c0_i32_0, %c0_i32_1 : i32, i32, i32
  }
  func.func @transform_16(%arg0: i32) -> (i32, i32) {
    %c0_i32 = arith.constant 0 : i32
    %c0_i32_0 = arith.constant 0 : i32
    %c0_i32_1 = arith.constant 0 : i32
    return %c0_i32, %c0_i32_0 : i32, i32
  }
  func.func @transform_17(%arg0: i32) -> (i32, i32) {
    %c0_i32 = arith.constant 0 : i32
    %c0_i32_0 = arith.constant 0 : i32
    %c0_i32_1 = arith.constant 0 : i32
    return %c0_i32, %c0_i32_0 : i32, i32
  }
  func.func @transform_18(%arg0: i32) -> (i32, i32, i32) {
    %c0_i32 = arith.constant 0 : i32
    %c0_i32_0 = arith.constant 0 : i32
    %c0_i32_1 = arith.constant 0 : i32
    return %arg0, %c0_i32, %c0_i32_0 : i32, i32, i32
  }
}

</mosaic_0001>

<bundles_post_ra>
// kernel: bert_forward.1
= control target key start
LH: loop header
LB: loop body
LE: loop exit
PB: predicated region body
PF: predicated region fallthrough
CT: control target
= control target key end

     0   :  { %s4426_s0 = inlined_call_operand.vmem [shape: f32[2,16,32], index: 0, kind: input, shape index: {}]   ;;  %s4427_s1 = inlined_call_operand.vmem [shape: f32[2,2,8], index: 1, kind: input, shape index: {}]   ;;  %s4428_s2 = inlined_call_operand.vmem [shape: f32[1,32], index: 2, kind: input, shape index: {}]   ;;  %s4429_s3 = inlined_call_operand.vmem [shape: f32[1,32], index: 3, kind: input, shape index: {}]   ;;  %s4430_s4 = inlined_call_operand.vmem [shape: f32[2,32,96], index: 4, kind: input, shape index: {}]   ;;  %s4431_s5 = inlined_call_operand.vmem [shape: f32[2,1,96], index: 5, kind: input, shape index: {}]   ;;  %s4432_s6 = inlined_call_operand.vmem [shape: f32[2,32,32], index: 6, kind: input, shape index: {}]   ;;  %s4433_s7 = inlined_call_operand.vmem [shape: f32[2,1,32], index: 7, kind: input, shape index: {}]   ;;  %s4434_s8 = inlined_call_operand.vmem [shape: f32[2,1,32], index: 8, kind: input, shape index: {}]   ;;  %s4435_s9 = inlined_call_operand.vmem [shape: f32[2,1,32], index: 9, kind: input, shape index: {}]   ;;  %s4436_s10 = inlined_call_operand.vmem [shape: f32[2,32,64], index: 10, kind: input, shape index: {}]   ;;  %s4437_s11 = inlined_call_operand.vmem [shape: f32[2,1,64], index: 11, kind: input, shape index: {}]   ;;  %s4438_s12 = inlined_call_operand.vmem [shape: f32[2,64,32], index: 12, kind: input, shape index: {}]   ;;  %s4439_s13 = inlined_call_operand.vmem [shape: f32[2,1,32], index: 13, kind: input, shape index: {}]   ;;  %s4440_s14 = inlined_call_operand.vmem [shape: f32[2,1,32], index: 14, kind: input, shape index: {}]   ;;  %s4441_s15 = inlined_call_operand.vmem [shape: f32[2,1,32], index: 15, kind: input, shape index: {}]   ;;  %s4442_s16 = inlined_call_operand.vmem [shape: f32[32,32], index: 16, kind: input, shape index: {}]   ;;  %s4443_s17 = inlined_call_operand.vmem [shape: f32[1,32], index: 17, kind: input, shape index: {}]   ;;  %s4444_s18 = inlined_call_operand.hbm [shape: f32[2,2,32], index: 18, kind: output, shape index: {}]  }
   0x1   :  { %4458 = sst [smem:[#allocation8_spill]] %s4426_s0 }
   0x2   :  { %4459 = sst [smem:[#allocation9_spill]] %s4427_s1 }
   0x3   :  { %4460 = sst [smem:[#allocation10_spill]] %s4428_s2 }
   0x4   :  { %4461 = sst [smem:[#allocation11_spill]] %s4429_s3 }
   0x5   :  { %4462 = sst [smem:[#allocation12_spill]] %s4430_s4 }
   0x6   :  { %23 = vsyncpa [#allocation3], 0 }
   0x7   :  { %25 = vsyncpa [#allocation3 + $0x1], 0  ;;  %s3912_s27 = smov 0   ;;  %s3914_s28 = smov 0  }
   0x8   :  { %s3916_s29 = smov 0   ;;  %s3918_s30 = smov 0  }
   0x9 LB: > { %4463 = sst [smem:[#allocation5_spill]] %s3801_s29  ;;  %s3933_s0 = sadd.s32 4294967295, %s3805_s30   ;;  %s3805_s30 = sphi %s3918_s30, %s4478_s30   ;;  %s3801_s29 = sphi %s3916_s29, %s4480_s29   ;;  %s3797_s28 = sphi %s3914_s28, %s4482_s28   ;;  %s3793_s27 = sphi %s3912_s27, %s4481_s27  }
   0xa   : > { %s3158_s19 = sadd.s32 4294967294, %s3805_s30   ;;  %s3937_s1 = sadd.s32 1, %s3805_s30  }
   0xb   : > { %4464 = sst [smem:[#allocation6_spill]] %s3937_s1  ;;  %s426_s20 = sadd.s32 1, %s3801_s29 }
   0xc   : > { %s423_s21 = ssub.s32 %s3805_s30, %s3937_s1  ;;  %p436_p0 = scmp.ne.s32.totalorder %s3801_s29, %s3797_s28 }
   0xd   : > { %p424_p1 = scmp.eq.s32.totalorder %s423_s21, 0  ;;  %p437_p2 = scmp.eq.s32.totalorder %s3933_s0, 1 }
   0xe   : > { %p442_p3 = scmp.ne.s32.totalorder %s3797_s28, %s3793_s27  ;;  %p443_p4 = scmp.eq.s32.totalorder %s3158_s19, 1 }
   0xf   : > { %s3948_s22 = scalar_select %p424_p1, %s3801_s29, %s426_s20  }
  0x10   : > { %p3950_p5 = por %p437_p2, %p436_p0  ;;  %p3954_p6 = por %p443_p4, %p442_p3 }
  0x11   : > { %4465 = sst [smem:[#allocation7_spill]] %s3948_s22  ;;  %p3161_p7 = scmp.ge.s32.totalorder %s3805_s30, 1 }
  0x12   : > { %p524_p8 = scmp.lt.s32.totalorder %s3805_s30, 3 }
  0x14   : > { %p525_p9 = pnand %p3161_p7, %p524_p8 }
  0x15   : > { %p582_p10 = scmp.lt.s32.totalorder (!%p525_p9), %s3933_s0, 1  ;;  %vm598_vm0 = vcmask (!%p525_p9), 261120   ;;  %s4468_s20 = sld [smem:[#allocation8_spill]] (!%p525_p9)  ;;  %v3807_v36 = vmov (!%p525_p9), 0.0   ;;  %vm3808_vm1 = vmmov (!%p525_p9), 0   ;;  %vm737_vm2 = vcmask (!%p525_p9), 130048  }
  0x16   : > { %528 = sbr.rel (%p525_p9) target bundleno = 6189 (0x182d), region = 92  ;;  %s4469_s4 = sld [smem:[#allocation12_spill]] (!%p525_p9)  ;;  %3363 = vmatprep.subr.mxu1 (!%p525_p9), %v3807_v36  ;;  %3365 = vmatprep.mubr.msk.f32.mxu1 (!%p525_p9), %vm3808_vm1, %v3807_v36  ;;  %v3168_v37 = vld [vmem:[%s4431_s5] ss:$0 sm:$0xff] (!%p525_p9)  ;;  %v813_v45 = vlaneseq (!%p525_p9)  ;;  %vm818_vm3 = vcmask (!%p525_p9), 64512   ;;  %vm1683_vm4 = vcmask (!%p525_p9), 523264  }
  0x17   : > { %s4470_s26 = sld [smem:[#allocation10_spill]] (!%p525_p9)  ;;  %s4471_s3 = sld [smem:[#allocation11_spill]] (!%p525_p9)  ;;  %vm2984_vm5 = vcmask (!%p525_p9), 1040384   ;;  %vm3071_vm6 = vcmask (!%p525_p9), 254976  }
  0x18   : > { %s3810_s22 = smov (!%p525_p9), 80   ;;  %s4472_s19 = sld [smem:[#allocation9_spill]] (!%p525_p9)  ;;  %v814_v48 = vshrl.u32 (!%p525_p9), %v813_v45, 7 }
  0x19   : > { %s4456_s29 = smov (!%p525_p9), 16  }
  0x1a   : > { %v815_v50 = vsub.s32 (!%p525_p9), 0, %v814_v48  ;;  %v1158_v55 = vsub.s32 (!%p525_p9), 1, %v814_v48 }
  0x1c   : > { %v642_v14 = vld [vmem:[%s4469_s4] sm:$0xff] (!%p525_p9)  ;;  %v643_v15 = vld [vmem:[%s4469_s4 + $0x8] sm:$0xff] (!%p525_p9)  ;;  %v644_v16 = vld [vmem:[%s4469_s4 + $0x10] sm:$0xff] (!%p525_p9) }
  0x1d   : > { %s3962_s24 = scalar_select %p582_p10, %s3933_s0, 1  ;;  %v3547_v17 = vpack.c.bf16 %v643_v15, %v642_v14  ;;  %v645_v18 = vld [vmem:[%s4469_s4 + $0x18] sm:$0xff]  ;;  %v3166_v27 = vld [vmem:[%s4470_s26] ss:$0 sm:$0xff] }
  0x1e   : > { %v3551_v19 = vpack.c.bf16 %v645_v18, %v644_v16  ;;  %v3167_v29 = vld [vmem:[%s4471_s3] ss:$0 sm:$0xff] }
  0x1f   : > { %s3258_s25 = sshll.u32 %s3962_s24, 4  ;;  %3548 = vmatprep.subr.bf16.mxu0 %v3547_v17  ;;  %s3165_s26 = sshll.u32 %s3962_s24, 1 }
  0x20   : > { %s586_s21 = scalar_lea.vmem %s4468_s20, %s3258_s25  ;;  %3550 = vmatpush3.bf16.msra.mxu0 %v3547_v17  ;;  %s4452_s25 = smov 112  }
  0x21   : > { %v594_v0 = vld [vmem:[%s586_s21] sm:$0xff]  ;;  %v595_v1 = vld [vmem:[%s586_s21 + $0x8] sm:$0xff]  ;;  %3552 = vmatprep.subr.bf16.mxu0 %v3551_v19  ;;  %s4454_s21 = smov 96   ;;  %s590_s20 = scalar_lea.vmem %s4472_s19, %s3165_s26 }
  0x22   : > { %v599_v2 = vsel %vm598_vm0, %v594_v0, 0.0  ;;  %v602_v3 = vsel %vm598_vm0, %v595_v1, 0.0  ;;  %v591_v46 = vld [vmem:[%s590_s20] sm:$0x3]  ;;  %s4448_s24 = smov 64   ;;  %s4450_s26 = smov 48  }
  0x23   : > { %600 = vadd.xlane.f32.xlu0 %v599_v2  ;;  %v592_v47 = vsub.f32 1.0, %v591_v46  ;;  %s579_s19 = sand.u32 1, %s3797_s28  }
  0x24   : > { %3554 = vmatpush3.bf16.msra.mxu0 %v3551_v19  ;;  %s3162_s20 = sshll.u32 %s579_s19, 1  ;;  %s3074_s1 = scalar_lea.sflag [#allocation3], %s579_s19 }
  0x25   : > { %3383 = vmatprep.subr.mxu0 %v3807_v36  ;;  %v593_v49 = vmul.f32 -1e+09, %v592_v47 }
  0x27   : > { %603 = vadd.xlane.f32.xlu0 %v602_v3  ;;  %v4035_v51 = vrot.slane %v593_v49, %v815_v50  ;;  %v4039_v58 = vrot.slane %v593_v49, %v1158_v55  ;;  %v1420_v55 = vld [vmem:[%s4432_s6] sm:$0xff] }
  0xb0   : > { %v601_v4 = vpop.xlane.xlu0 %600 }
  0xb1   : > { %v606_v5 = vmul.f32 0.03125, %v601_v4 }
  0xb3   : > { %v608_v6 = vsub.f32 %v594_v0, %v606_v5 }
  0xb4   : > { %v604_v7 = vpop.xlane.xlu0 %603 }
  0xb5   : > { %v607_v8 = vmul.f32 0.03125, %v604_v7  ;;  %v610_v9 = vmul.f32 %v608_v6, %v608_v6 }
  0xb7   : > { %v609_v10 = vsub.f32 %v595_v1, %v607_v8  ;;  %v612_v11 = vsel %vm598_vm0, %v610_v9, 0.0 }
  0xb8   : > { %613 = vadd.xlane.f32.xlu1 %v612_v11 }
  0xb9   : > { %v611_v12 = vmul.f32 %v609_v10, %v609_v10 }
  0xbb   : > { %v615_v13 = vsel %vm598_vm0, %v611_v12, 0.0 }
  0xbc   : > { %616 = vadd.xlane.f32.xlu1 %v615_v13 }
 0x145   : > { %v614_v20 = vpop.xlane.xlu1 %613 }
 0x146   : > { %v618_v21 = vmul.f32 0.03125, %v614_v20 }
 0x148   : > { %v620_v22 = vadd.f32 1e-12, %v618_v21 }
 0x149   : > { %v617_v23 = vpop.xlane.xlu1 %616 }
 0x14a   : > { %3681 = vrsqrt.f32 %v620_v22  ;;  %v619_v24 = vmul.f32 0.03125, %v617_v23 }
 0x14c   : > { %v621_v25 = vadd.f32 1e-12, %v619_v24 }
 0x14e   : > { %3683 = vrsqrt.f32 %v621_v25 }
 0x154   : > { %v3682_v26 = vpop.eup %3681 }
 0x155   : > { %v624_v28 = vmul.f32 %v3682_v26, %v608_v6 }
 0x157   : > { %v632_v30 = vmul.f32 %v3166_v27, %v624_v28 }
 0x158   : > { %v3684_v31 = vpop.eup %3683 }
 0x159   : > { %v625_v32 = vmul.f32 %v3684_v31, %v609_v10  ;;  %v3990_v33 = vadd.f32 %v3167_v29, %v632_v30 }
 0x15b   : > { %v633_v34 = vmul.f32 %v3166_v27, %v625_v32  ;;  %3360 = vmatprep.mubr.msk.f32.mxu0 %vm598_vm0, %v3990_v33 }
 0x15d   : > { %v3994_v35 = vadd.f32 %v3167_v29, %v633_v34 }
 0x15f   : > { %3361 = vmatmul.mubr.msk.f32.vlgmr.msra.gmra.mrb[0].mxu0 %vm598_vm0, %v3994_v35 }
 0x160   : > { %3385 = vmatprep.mubr.msk.f32.mxu0 %vm3808_vm1, %v3807_v36 }
 0x232   : > { %v3362_v38 = vpop.f32.mrb[0].mxu0 }
 0x233   : > { %v725_v39 = vpop.f32.mrb[1].mxu0  ;;  %v4013_v41 = vadd.f32 %v3362_v38, %v3168_v37 }
 0x234   : > { %v4007_v40 = vadd.f32 %v3168_v37, %v725_v39 }
 0x236   : > { %735 = vrot.lane.b32.xlu0 %v4007_v40, %s4454_s21 }
 0x23a   : > { %908 = vrot.lane.b32.xlu0 %v4007_v40, %s3810_s22 }
 0x23e   : > { %1079 = vrot.lane.b32.xlu0 %v4013_v41, %s4454_s21  ;;  %s4473_s21 = smov 96  }
 0x242   : > { %1248 = vrot.lane.b32.xlu0 %v4013_v41, %s4452_s25 }
 0x2a8   : > { %v736_v42 = vpop.permute.xlu0 %735 }
 0x2a9   : > { %3364 = vmatpush3.xpose.msk.msra.mxu1 %vm737_vm2, %v736_v42 }
 0x2aa   : > { %3368 = vmatprep.subr.mxu1 %v3807_v36 }
 0x2ac   : > { %3366 = vmatmul.mubr.msk.f32.vlgmr.msra.gmra.mrb[0].mxu1 %vm737_vm2, %v4007_v40  ;;  %v909_v43 = vpop.permute.xlu0 %908 }
 0x2ad   : > { %3370 = vmatprep.mubr.msk.f32.mxu1 %vm3808_vm1, %v3807_v36 }
 0x2b0   : > { %v1080_v44 = vpop.permute.xlu0 %1079 }
 0x2b1   : > { %3384 = vmatpush3.xpose.msk.msra.mxu0 %vm737_vm2, %v1080_v44 }
 0x2b2   : > { %3393 = vmatprep.subr.mxu0 %v3807_v36 }
 0x2b4   : > { %3386 = vmatmul.mubr.msk.f32.vlgmr.msra.gmra.mrb[2].mxu0 %vm737_vm2, %v4013_v41  ;;  %v1249_v9 = vpop.permute.xlu0 %1248 }
 0x2b5   : > { %3395 = vmatprep.mubr.msk.f32.mxu0 %vm3808_vm1, %v3807_v36 }
 0x37f   : > { %v808_v52 = vpop.f32.mrb[0].mxu1 }
 0x380   : > { %v812_v53 = vmul.f32 0.25, %v808_v52  ;;  %v3367_v54 = vpop.f32.mrb[1].mxu1 }
 0x382   : > { %v817_v56 = vadd.f32 %v4035_v51, %v812_v53 }
 0x384   : > { %v819_v57 = vsel %vm818_vm3, %v817_v56, -inf }
 0x385   : > { %820 = vmax.xlane.f32.xlu1 %v819_v57 }
 0x387   : > { %v1151_v59 = vpop.f32.mrb[2].mxu0 }
 0x388   : > { %v1155_v60 = vmul.f32 0.25, %v1151_v59  ;;  %v3387_v61 = vpop.f32.mrb[3].mxu0  ;;  %v1422_v59 = vld [vmem:[%s4432_s6 + $0x10] sm:$0xff] }
 0x38a   : > { %v1160_v62 = vadd.f32 %v4039_v58, %v1155_v60  ;;  %v1423_v60 = vld [vmem:[%s4432_s6 + $0x18] sm:$0xff] }
 0x38b   : > { %v3559_v61 = vpack.c.bf16 %v1423_v60, %v1422_v59  ;;  %v1673_v59 = vld [vmem:[%s4438_s12 + $0x28] sm:$0xff] }
 0x38c   : > { %v1161_v63 = vsel %vm818_vm3, %v1160_v62, -inf }
 0x38d   : > { %1162 = vmax.xlane.f32.xlu0 %v1161_v63 }
 0x396   : > { %830 = vrot.lane.b32.xlu1 %v4007_v40, %s4448_s24 }
 0x39a   : > { %906 = vrot.lane.b32.xlu1 %v4007_v40, %s4452_s25  ;;  %s4474_s25 = smov 112  }
 0x412   : > { %v821_v0 = vpop.xlane.xlu1 %820 }
 0x413   : > { %v822_v1 = vsub.f32 %v817_v56, %v821_v0  ;;  %v1421_v56 = vld [vmem:[%s4432_s6 + $0x8] sm:$0xff] }
 0x414   : > { %v3555_v57 = vpack.c.bf16 %v1421_v56, %v1420_v55  ;;  %v1671_v55 = vld [vmem:[%s4438_s12 + $0x18] sm:$0xff] }
 0x415   : > { %v823_v2 = vmul.f32 1.442695, %v822_v1 }
 0x416   : > { %v831_v3 = vpop.permute.xlu1 %830 }
 0x417   : > { %3685 = vpow2.f32 %v823_v2  ;;  %3369 = vmatpush3.msra.mxu1 %v831_v3 }
 0x418   : > { %3373 = vmatprep.subr.mxu1 %v3807_v36 }
 0x41a   : > { %v907_v6 = vpop.permute.xlu1 %906  ;;  %v1163_v12 = vpop.xlane.xlu0 %1162 }
 0x41b   : > { %v1164_v13 = vsub.f32 %v1160_v62, %v1163_v12 }
 0x41d   : > { %v1165_v17 = vmul.f32 1.442695, %v1164_v13 }
 0x421   : > { %v3686_v4 = vpop.eup %3685 }
 0x422   : > { %v825_v5 = vsel %vm818_vm3, %v3686_v4, 0.0 }
 0x423   : > { %826 = vadd.xlane.f32.xlu1 %v825_v5 }
 0x434   : > { %1250 = vrot.lane.b32.xlu1 %v4013_v41, %s3810_s22 }
 0x4b0   : > { %v827_v7 = vpop.xlane.xlu1 %826 }
 0x4b1   : > { %3687 = vrcp.f32 %v827_v7 }
 0x4b2   : > { %3689 = vpow2.f32 %v1165_v17 }
 0x4b4   : > { %v1251_v8 = vpop.permute.xlu1 %1250 }
 0x4b5   : > { %3394 = vmatpush3.xpose.msk.msra.mxu0 %vm737_vm2, %v1251_v8  ;;  %v3183_v8 = vld [vmem:[%s4433_s7] ss:$0 sm:$0xff] }
 0x4b6   : > { %3556 = vmatprep.subr.bf16.mxu0 %v3555_v57 }
 0x4b8   : > { %3396 = vmatmul.mubr.msk.f32.vlgmr.msra.gmra.mrb[4].mxu0 %vm737_vm2, %v1249_v9 }
 0x4b9   : > { %3558 = vmatpush3.bf16.msra.mxu0 %v3555_v57  ;;  %v1672_v57 = vld [vmem:[%s4438_s12 + $0x20] sm:$0xff] }
 0x4ba   : > { %3560 = vmatprep.subr.bf16.mxu0 %v3559_v61  ;;  %v3579_v60 = vpack.c.bf16 %v1673_v59, %v1672_v57  ;;  %v3194_v57 = vld [vmem:[%s4440_s14] ss:$0 sm:$0xff] }
 0x4bb   : > { %v3688_v10 = vpop.eup %3687 }
 0x4bc   : > { %v829_v11 = vmul.f32 %v3688_v10, %v3686_v4  ;;  %v3690_v27 = vpop.eup %3689 }
 0x4bd   : > { %v1167_v28 = vsel %vm818_vm3, %v3690_v27, 0.0  ;;  %3562 = vmatpush3.bf16.msra.mxu0 %v3559_v61  ;;  %v1674_v61 = vld [vmem:[%s4438_s12 + $0x30] sm:$0xff] }
 0x4be   : > { %3371 = vmatmul.mubr.msk.f32.vlgmr.msra.gmra.mrb[2].mxu1 %vm818_vm3, %v829_v11 }
 0x4bf   : > { %3374 = vmatpush3.xpose.msk.msra.mxu1 %vm737_vm2, %v909_v43  ;;  %3375 = vmatprep.mubr.msk.f32.mxu1 %vm3808_vm1, %v3807_v36 }
 0x4c0   : > { %3378 = vmatprep.subr.mxu1 %v3807_v36 }
 0x4c2   : > { %3376 = vmatmul.mubr.msk.f32.vlgmr.msra.gmra.mrb[4].mxu1 %vm737_vm2, %v907_v6 }
 0x4c3   : > { %3380 = vmatprep.mubr.msk.f32.mxu1 %vm3808_vm1, %v3807_v36 }
 0x58b   : > { %v1322_v14 = vpop.f32.mrb[4].mxu0 }
 0x58c   : > { %v1326_v15 = vmul.f32 0.25, %v1322_v14  ;;  %v3397_v16 = vpop.f32.mrb[5].mxu0 }
 0x58e   : > { %v1327_v18 = vadd.f32 %v1326_v15, %v4039_v58 }
 0x590   : > { %v1328_v19 = vsel %vm818_vm3, %v1327_v18, -inf }
 0x591   : > { %v4063_v20 = vpop.f32.mrb[2].mxu1  ;;  %1329 = vmax.xlane.f32.xlu0 %v1328_v19 }
 0x592   : > { %v3372_v21 = vpop.f32.mrb[3].mxu1 }
 0x595   : > { %v980_v22 = vpop.f32.mrb[4].mxu1 }
 0x596   : > { %v984_v23 = vmul.f32 0.25, %v980_v22  ;;  %v3377_v24 = vpop.f32.mrb[5].mxu1 }
 0x598   : > { %v985_v25 = vadd.f32 %v984_v23, %v4035_v51 }
 0x59a   : > { %v986_v26 = vsel %vm818_vm3, %v985_v25, -inf }
 0x59b   : > { %987 = vmax.xlane.f32.xlu1 %v986_v26  ;;  %v1559_v26 = vld [vmem:[%s4436_s10 + $0x8] sm:$0xff] }
 0x59f   : > { %1168 = vadd.xlane.f32.xlu1 %v1167_v28  ;;  %v1560_v28 = vld [vmem:[%s4436_s10 + $0x10] sm:$0xff] }
 0x5b0   : > { %997 = vrot.lane.b32.xlu1 %v4007_v40, %s4450_s26 }
 0x5b4   : > { %1339 = vrot.lane.b32.xlu1 %v4013_v41, %s4450_s26 }
 0x61e   : > { %v1330_v29 = vpop.xlane.xlu0 %1329 }
 0x61f   : > { %v1331_v30 = vsub.f32 %v1327_v18, %v1330_v29  ;;  %v1561_v29 = vld [vmem:[%s4436_s10 + $0x18] sm:$0xff] }
 0x621   : > { %v1332_v31 = vmul.f32 1.442695, %v1331_v30  ;;  %v3567_v30 = vpack.c.bf16 %v1561_v29, %v1560_v28 }
 0x623   : > { %3691 = vpow2.f32 %v1332_v31 }
 0x628   : > { %v988_v32 = vpop.xlane.xlu1 %987 }
 0x629   : > { %v989_v34 = vsub.f32 %v985_v25, %v988_v32 }
 0x62b   : > { %v990_v37 = vmul.f32 1.442695, %v989_v34 }
 0x62c   : > { %v1169_v38 = vpop.xlane.xlu1 %1168 }
 0x62d   : > { %v3692_v39 = vpop.eup %3691  ;;  %3693 = vpow2.f32 %v990_v37 }
 0x62e   : > { %v1334_v42 = vsel %vm818_vm3, %v3692_v39, 0.0 }
 0x62f   : > { %1335 = vadd.xlane.f32.xlu0 %v1334_v42 }
 0x630   : > { %v998_v43 = vpop.permute.xlu1 %997 }
 0x631   : > { %3379 = vmatpush3.msra.mxu1 %v998_v43  ;;  %v3186_v43 = vld [vmem:[%s4434_s8] ss:$0 sm:$0xff] }
 0x632   : > { %3388 = vmatprep.subr.mxu1 %v3807_v36 }
 0x637   : > { %v3694_v40 = vpop.eup %3693 }
 0x638   : > { %v992_v44 = vsel %vm818_vm3, %v3694_v40, 0.0 }
 0x639   : > { %993 = vadd.xlane.f32.xlu0 %v992_v44  ;;  %v3187_v44 = vld [vmem:[%s4435_s9] ss:$0 sm:$0xff] }
 0x64f   : > { %1172 = vrot.lane.b32.xlu0 %v4013_v41, %s4448_s24  ;;  %v1340_v41 = vpop.permute.xlu1 %1339  ;;  %s4476_s24 = smov 64  }
 0x6bc   : > { %v1336_v45 = vpop.xlane.xlu0 %1335 }
 0x6c6   : > { %v994_v46 = vpop.xlane.xlu0 %993 }
 0x6c7   : > { %3695 = vrcp.f32 %v994_v46 }
 0x6c8   : > { %3697 = vrcp.f32 %v1169_v38 }
 0x6c9   : > { %3699 = vrcp.f32 %v1336_v45 }
 0x6ca   : > { %v1173_v50 = vpop.permute.xlu0 %1172 }
 0x6d1   : > { %v3696_v47 = vpop.eup %3695 }
 0x6d2   : > { %v996_v48 = vmul.f32 %v3696_v47, %v3694_v40  ;;  %v3698_v49 = vpop.eup %3697 }
 0x6d3   : > { %v1171_v52 = vmul.f32 %v3698_v49, %v3690_v27  ;;  %v3700_v53 = vpop.eup %3699 }
 0x6d4   : > { %3381 = vmatmul.mubr.msk.f32.vlgmr.msra.gmra.mrb[6].mxu1 %vm818_vm3, %v996_v48  ;;  %v1338_v54 = vmul.f32 %v3700_v53, %v3692_v39  ;;  %v1669_v53 = vld [vmem:[%s4438_s12 + $0x8] sm:$0xff] }
 0x6d5   : > { %3389 = vmatpush3.msra.mxu1 %v1173_v50  ;;  %3390 = vmatprep.mubr.msk.f32.mxu1 %vm3808_vm1, %v3807_v36 }
 0x6d6   : > { %3398 = vmatprep.subr.mxu1 %v3807_v36 }
 0x6d8   : > { %3391 = vmatmul.mubr.msk.f32.vlgmr.msra.gmra.mrb[8].mxu1 %vm818_vm3, %v1171_v52  ;;  %v1668_v52 = vld [vmem:[%s4438_s12] sm:$0xff] }
 0x6d9   : > { %3399 = vmatpush3.msra.mxu1 %v1340_v41  ;;  %3400 = vmatprep.mubr.msk.f32.mxu1 %vm3808_vm1, %v3807_v36  ;;  %v3571_v41 = vpack.c.bf16 %v1669_v53, %v1668_v52 }
 0x6db   : > { %3572 = vmatprep.subr.bf16.mxu0 %v3571_v41 }
 0x6dc   : > { %3401 = vmatmul.mubr.msk.f32.vlgmr.msra.gmra.mrb[10].mxu1 %vm818_vm3, %v1338_v54  ;;  %v1670_v54 = vld [vmem:[%s4438_s12 + $0x10] sm:$0xff] }
 0x6dd   : > { %v3575_v56 = vpack.c.bf16 %v1671_v55, %v1670_v54 }
 0x7a7   : > { %v1069_v62 = vpop.f32.mrb[6].mxu1 }
 0x7a8   : > { %1074 = vrot.lane.b32.xlu1 %v1069_v62, %s4456_s29  ;;  %v3382_v63 = vpop.f32.mrb[7].mxu1  ;;  %v1675_v62 = vld [vmem:[%s4438_s12 + $0x38] sm:$0xff] }
 0x7a9   : > { %v3583_v63 = vpack.c.bf16 %v1675_v62, %v1674_v61  ;;  %v3195_v62 = vld [vmem:[%s4441_s15] ss:$0 sm:$0xff] }
 0x7ab   : > { %v1244_v0 = vpop.f32.mrb[8].mxu1 }
 0x7ac   : > { %v3392_v1 = vpop.f32.mrb[9].mxu1 }
 0x7af   : > { %v1411_v2 = vpop.f32.mrb[10].mxu1 }
 0x7b0   : > { %1416 = vrot.lane.b32.xlu1 %v1411_v2, %s4456_s29  ;;  %v3402_v3 = vpop.f32.mrb[11].mxu1 }
 0x81a   : > { %v1075_v4 = vpop.permute.xlu1 %1074 }
 0x81b   : > { %v1077_v5 = vsel %vm737_vm2, %v4063_v20, %v1075_v4 }
 0x81c   : > { %3411 = vmatprep.mubr.msk.f32.mxu0 %vm598_vm0, %v1077_v5 }
 0x822   : > { %v1417_v6 = vpop.permute.xlu1 %1416 }
 0x823   : > { %v1419_v7 = vsel %vm737_vm2, %v1244_v0, %v1417_v6  ;;  %v3188_v0 = vld [vmem:[%s4437_s11] ss:$0 sm:$0xff] }
 0x824   : > { %3412 = vmatmul.mubr.msk.f32.vlgmr.msra.gmra.mrb[6].mxu0 %vm598_vm0, %v1419_v7 }
 0x825   : > { %3574 = vmatpush3.bf16.msra.mxu0 %v3571_v41 }
 0x826   : > { %3576 = vmatprep.subr.bf16.mxu0 %v3575_v56 }
 0x829   : > { %3578 = vmatpush3.bf16.msra.mxu0 %v3575_v56 }
 0x82a   : > { %3580 = vmatprep.subr.bf16.mxu0 %v3579_v60 }
 0x82d   : > { %3582 = vmatpush3.bf16.msra.mxu0 %v3579_v60 }
 0x82e   : > { %3584 = vmatprep.subr.bf16.mxu0 %v3583_v63 }
 0x831   : > { %3586 = vmatpush3.bf16.msra.mxu0 %v3583_v63 }
 0x832   : > { %3465 = vmatprep.subr.mxu0 %v3807_v36 }
 0x8f7   : > { %v3413_v9 = vpop.f32.mrb[6].mxu0 }
 0x8f8   : > { %v1509_v10 = vadd.f32 %v3413_v9, %v3183_v8  ;;  %v1503_v11 = vpop.f32.mrb[7].mxu0 }
 0x8f9   : > { %v1504_v12 = vadd.f32 %v3183_v8, %v1503_v11 }
 0x8fa   : > { %v1513_v13 = vadd.f32 %v1509_v10, %v3994_v35 }
 0x8fb   : > { %v1512_v14 = vadd.f32 %v1504_v12, %v3990_v33  ;;  %v1558_v33 = vld [vmem:[%s4436_s10] sm:$0xff] }
 0x8fc   : > { %v1519_v15 = vsel %vm598_vm0, %v1513_v13, 0.0  ;;  %v3563_v27 = vpack.c.bf16 %v1559_v26, %v1558_v33 }
 0x8fd   : > { %1520 = vadd.xlane.f32.xlu1 %v1519_v15  ;;  %v1516_v16 = vsel %vm598_vm0, %v1512_v14, 0.0 }
 0x8fe   : > { %1517 = vadd.xlane.f32.xlu0 %v1516_v16  ;;  %3564 = vmatprep.subr.bf16.mxu1 %v3563_v27 }
 0x8ff   : > { %3566 = vmatpush3.bf16.msra.mxu1 %v3563_v27 }
 0x900   : > { %3568 = vmatprep.subr.bf16.mxu1 %v3567_v30 }
 0x903   : > { %3570 = vmatpush3.bf16.msra.mxu1 %v3567_v30 }
 0x98a   : > { %v1521_v17 = vpop.xlane.xlu1 %1520 }
 0x98b   : > { %v1523_v18 = vmul.f32 0.03125, %v1521_v17  ;;  %v1518_v19 = vpop.xlane.xlu0 %1517 }
 0x98c   : > { %v1522_v20 = vmul.f32 0.03125, %v1518_v19 }
 0x98d   : > { %v1525_v21 = vsub.f32 %v1513_v13, %v1523_v18 }
 0x98e   : > { %v1524_v22 = vsub.f32 %v1512_v14, %v1522_v20 }
 0x98f   : > { %v1527_v25 = vmul.f32 %v1525_v21, %v1525_v21 }
 0x990   : > { %v1526_v23 = vmul.f32 %v1524_v22, %v1524_v22 }
 0x991   : > { %v1531_v35 = vsel %vm598_vm0, %v1527_v25, 0.0 }
 0x992   : > { %v1528_v24 = vsel %vm598_vm0, %v1526_v23, 0.0  ;;  %v3191_v23 = vld [vmem:[%s4439_s13] ss:$0 sm:$0xff] }
 0x993   : > { %1529 = vadd.xlane.f32.xlu0 %v1528_v24 }
 0x997   : > { %1532 = vadd.xlane.f32.xlu0 %v1531_v35 }
 0xa20   : > { %v1530_v31 = vpop.xlane.xlu0 %1529 }
 0xa21   : > { %v1534_v32 = vmul.f32 0.03125, %v1530_v31 }
 0xa23   : > { %v1536_v34 = vadd.f32 1e-12, %v1534_v32 }
 0xa24   : > { %v1533_v37 = vpop.xlane.xlu0 %1532 }
 0xa25   : > { %3701 = vrsqrt.f32 %v1536_v34  ;;  %v1535_v38 = vmul.f32 0.03125, %v1533_v37 }
 0xa27   : > { %v1537_v39 = vadd.f32 1e-12, %v1535_v38 }
 0xa29   : > { %3703 = vrsqrt.f32 %v1537_v39 }
 0xa2f   : > { %v3702_v42 = vpop.eup %3701 }
 0xa30   : > { %v1540_v40 = vmul.f32 %v3702_v42, %v1524_v22 }
 0xa32   : > { %v1548_v45 = vmul.f32 %v3186_v43, %v1540_v40 }
 0xa33   : > { %v3704_v46 = vpop.eup %3703 }
 0xa34   : > { %v1541_v47 = vmul.f32 %v3704_v46, %v1525_v21  ;;  %v1556_v48 = vadd.f32 %v3187_v44, %v1548_v45  ;;  %v3197_v45 = vld [vmem:[%s4469_s4 + $0x28] sm:$0xff] }
 0xa36   : > { %v1549_v49 = vmul.f32 %v3186_v43, %v1541_v47  ;;  %3422 = vmatprep.mubr.msk.f32.mxu1 %vm598_vm0, %v1556_v48  ;;  %v3198_v47 = vld [vmem:[%s4469_s4 + $0x30] sm:$0xff] }
 0xa38   : > { %v1557_v50 = vadd.f32 %v3187_v44, %v1549_v49  ;;  %v3196_v44 = vld [vmem:[%s4469_s4 + $0x20] sm:$0xff] }
 0xa39   : > { %v3587_v46 = vpack.c.bf16 %v3197_v45, %v3196_v44 }
 0xa3a   : > { %3423 = vmatmul.mubr.msk.f32.vlgmr.msra.gmra.mrb[12].mxu1 %vm598_vm0, %v1557_v50 }
 0xa3b   : > { %3588 = vmatprep.subr.bf16.mxu1 %v3587_v46 }
 0xa3c   : > { %3590 = vmatpush3.bf16.msra.mxu1 %v3587_v46 }
 0xb0d   : > { %v3424_v1 = vpop.f32.mrb[12].mxu1 }
 0xb0e   : > { %v1647_v2 = vadd.f32 %v3424_v1, %v3188_v0  ;;  %v1641_v3 = vpop.f32.mrb[13].mxu1 }
 0xb0f   : > { %v1642_v4 = vadd.f32 %v3188_v0, %v1641_v3  ;;  %v3201_v3 = vld [vmem:[%s4431_s5 + $0x1] ss:$0 sm:$0xff] }
 0xb10   : > { %v1651_v5 = vmul.f32 %v1647_v2, %v1647_v2 }
 0xb11   : > { %v1650_v6 = vmul.f32 %v1642_v4, %v1642_v4 }
 0xb12   : > { %v1653_v7 = vmul.f32 %v1651_v5, %v1647_v2 }
 0xb13   : > { %v1652_v8 = vmul.f32 %v1650_v6, %v1642_v4 }
 0xb14   : > { %v1655_v9 = vmul.f32 0.044715, %v1653_v7 }
 0xb15   : > { %v1654_v10 = vmul.f32 0.044715, %v1652_v8 }
 0xb16   : > { %v1657_v11 = vadd.f32 %v1655_v9, %v1647_v2 }
 0xb17   : > { %v1656_v12 = vadd.f32 %v1654_v10, %v1642_v4 }
 0xb18   : > { %v1659_v13 = vmul.f32 0.7978846, %v1657_v11 }
 0xb19   : > { %v1658_v14 = vmul.f32 0.7978846, %v1656_v12 }
 0xb1a   : > { %3705 = vtanh.f32 %v1659_v13 }
 0xb1b   : > { %3707 = vtanh.f32 %v1658_v14 }
 0xb24   : > { %v3706_v15 = vpop.eup %3705 }
 0xb25   : > { %v3708_v16 = vpop.eup %3707  ;;  %v1663_v17 = vadd.f32 1.0, %v3706_v15 }
 0xb26   : > { %v1662_v18 = vadd.f32 1.0, %v3708_v16 }
 0xb27   : > { %v1665_v19 = vmul.f32 0.5, %v1663_v17 }
 0xb28   : > { %v1664_v20 = vmul.f32 0.5, %v1662_v18 }
 0xb29   : > { %v1667_v22 = vmul.f32 %v1665_v19, %v1647_v2 }
 0xb2a   : > { %v1666_v21 = vmul.f32 %v1664_v20, %v1642_v4 }
 0xb2c   : > { %3441 = vmatprep.mubr.msk.f32.mxu0 %vm1683_vm4, %v1666_v21 }
 0xb2d   : > { %3442 = vmatmul.mubr.msk.f32.vlgmr.msra.gmra.mrb[8].mxu0 %vm1683_vm4, %v1667_v22 }
 0xb2e   : > { %3467 = vmatprep.mubr.msk.f32.mxu0 %vm3808_vm1, %v3807_v36 }
 0xc00   : > { %v3443_v24 = vpop.f32.mrb[8].mxu0 }
 0xc01   : > { %v1762_v25 = vadd.f32 %v3443_v24, %v3191_v23  ;;  %v1756_v35 = vpop.f32.mrb[9].mxu0 }
 0xc02   : > { %v1757_v33 = vadd.f32 %v3191_v23, %v1756_v35 }
 0xc03   : > { %v1766_v26 = vadd.f32 %v1762_v25, %v1557_v50 }
 0xc04   : > { %v1765_v27 = vadd.f32 %v1757_v33, %v1556_v48  ;;  %v3199_v48 = vld [vmem:[%s4469_s4 + $0x38] sm:$0xff] }
 0xc05   : > { %v1772_v28 = vsel %vm598_vm0, %v1766_v26, 0.0  ;;  %v3591_v49 = vpack.c.bf16 %v3199_v48, %v3198_v47 }
 0xc06   : > { %1773 = vadd.xlane.f32.xlu1 %v1772_v28  ;;  %v1769_v29 = vsel %vm598_vm0, %v1765_v27, 0.0 }
 0xc07   : > { %1770 = vadd.xlane.f32.xlu0 %v1769_v29  ;;  %3592 = vmatprep.subr.bf16.mxu1 %v3591_v49 }
 0xc08   : > { %3594 = vmatpush3.bf16.msra.mxu1 %v3591_v49 }
 0xc09   : > { %3455 = vmatprep.subr.mxu1 %v3807_v36 }
 0xc93   : > { %v1774_v30 = vpop.xlane.xlu1 %1773 }
 0xc94   : > { %v1776_v31 = vmul.f32 0.03125, %v1774_v30  ;;  %v1771_v32 = vpop.xlane.xlu0 %1770 }
 0xc95   : > { %v1775_v34 = vmul.f32 0.03125, %v1771_v32 }
 0xc96   : > { %v1778_v37 = vsub.f32 %v1766_v26, %v1776_v31 }
 0xc97   : > { %v1777_v38 = vsub.f32 %v1765_v27, %v1775_v34 }
 0xc98   : > { %v1780_v39 = vmul.f32 %v1778_v37, %v1778_v37 }
 0xc99   : > { %v1779_v42 = vmul.f32 %v1777_v38, %v1777_v38 }
 0xc9a   : > { %v1784_v43 = vsel %vm598_vm0, %v1780_v39, 0.0 }
 0xc9b   : > { %1785 = vadd.xlane.f32.xlu1 %v1784_v43  ;;  %v1781_v40 = vsel %vm598_vm0, %v1779_v42, 0.0 }
 0xc9c   : > { %1782 = vadd.xlane.f32.xlu0 %v1781_v40 }
 0xd28   : > { %v1786_v50 = vpop.xlane.xlu1 %1785 }
 0xd29   : > { %v1788_v52 = vmul.f32 0.03125, %v1786_v50  ;;  %v1783_v53 = vpop.xlane.xlu0 %1782 }
 0xd2a   : > { %v1787_v41 = vmul.f32 0.03125, %v1783_v53 }
 0xd2b   : > { %v1790_v54 = vadd.f32 1e-12, %v1788_v52 }
 0xd2c   : > { %v1789_v55 = vadd.f32 1e-12, %v1787_v41 }
 0xd2d   : > { %3709 = vrsqrt.f32 %v1790_v54 }
 0xd2e   : > { %3711 = vrsqrt.f32 %v1789_v55 }
 0xd37   : > { %v3710_v56 = vpop.eup %3709 }
 0xd38   : > { %v3712_v59 = vpop.eup %3711  ;;  %v1794_v60 = vmul.f32 %v3710_v56, %v1778_v37 }
 0xd39   : > { %v1793_v61 = vmul.f32 %v3712_v59, %v1777_v38 }
 0xd3a   : > { %v1802_v63 = vmul.f32 %v3194_v57, %v1794_v60 }
 0xd3b   : > { %v1801_v0 = vmul.f32 %v3194_v57, %v1793_v61 }
 0xd3c   : > { %v4193_v2 = vadd.f32 %v3195_v62, %v1802_v63 }
 0xd3d   : > { %v4191_v1 = vadd.f32 %v3195_v62, %v1801_v0 }
 0xd3f   : > { %3452 = vmatprep.mubr.msk.f32.mxu1 %vm598_vm0, %v4191_v1 }
 0xd40   : > { %3453 = vmatmul.mubr.msk.f32.vlgmr.msra.gmra.mrb[14].mxu1 %vm598_vm0, %v4193_v2 }
 0xd41   : > { %3457 = vmatprep.mubr.msk.f32.mxu1 %vm3808_vm1, %v3807_v36 }
 0xe13   : > { %v3454_v4 = vpop.f32.mrb[14].mxu1 }
 0xe14   : > { %v1896_v5 = vpop.f32.mrb[15].mxu1  ;;  %v4210_v7 = vadd.f32 %v3454_v4, %v3201_v3 }
 0xe15   : > { %v4204_v6 = vadd.f32 %v3201_v3, %v1896_v5 }
 0xe17   : > { %2073 = vrot.lane.b32.xlu1 %v4204_v6, %s3810_s22  ;;  %1906 = vrot.lane.b32.xlu0 %v4204_v6, %s4473_s21 }
 0xe1b   : > { %2071 = vrot.lane.b32.xlu1 %v4204_v6, %s4474_s25  ;;  %2411 = vrot.lane.b32.xlu0 %v4210_v7, %s3810_s22  ;;  %s4475_s22 = smov 48  }
 0xe1f   : > { %2244 = vrot.lane.b32.xlu1 %v4210_v7, %s4473_s21  ;;  %s3255_s21 = sshll.u32 %s3933_s0, 5  ;;  %s3816_s0 = smov [#allocation2]  }
 0xe20   : > { %s4384_s3 = scalar_lea.hbm %s4444_s18, %s3255_s21 }
 0xe23   : > { %2409 = vrot.lane.b32.xlu1 %v4210_v7, %s4474_s25  ;;  %s581_s25 = scalar_lea.vmem [#allocation2], %s3162_s20  ;;  %s3747_s20 = sshll.u32 %s3816_s0, 4  ;;  %s3748_s20 = int_to_ptr.vmem [resolvable:$false] %s3747_s20 }
 0xe24   : > { %s3749_s4 = scalar_lea.vmem %s3748_s20, 64 }
 0xe89   : > { %v2074_v8 = vpop.permute.xlu1 %2073  ;;  %v1907_v9 = vpop.permute.xlu0 %1906 }
 0xe8a   : > { %3456 = vmatpush3.xpose.msk.msra.mxu1 %vm737_vm2, %v1907_v9  ;;  %3466 = vmatpush3.xpose.msk.msra.mxu0 %vm737_vm2, %v2074_v8  ;;  %v3216_v9 = vld [vmem:[%s4432_s6 + $0x20] sm:$0xff] }
 0xe8b   : > { %3475 = vmatprep.subr.mxu0 %v3807_v36  ;;  %3460 = vmatprep.subr.mxu1 %v3807_v36 }
 0xe8d   : > { %v2072_v10 = vpop.permute.xlu1 %2071  ;;  %3458 = vmatmul.mubr.msk.f32.vlgmr.msra.gmra.mrb[16].mxu1 %vm737_vm2, %v4204_v6  ;;  %v2412_v12 = vpop.permute.xlu0 %2411 }
 0xe8e   : > { %3468 = vmatmul.mubr.msk.f32.vlgmr.msra.gmra.mrb[10].mxu0 %vm737_vm2, %v2072_v10  ;;  %3462 = vmatprep.mubr.msk.f32.mxu1 %vm3808_vm1, %v3807_v36  ;;  %v3217_v10 = vld [vmem:[%s4432_s6 + $0x28] sm:$0xff] }
 0xe8f   : > { %3477 = vmatprep.mubr.msk.f32.mxu0 %vm3808_vm1, %v3807_v36 }
 0xe91   : > { %v2245_v11 = vpop.permute.xlu1 %2244 }
 0xe92   : > { %3476 = vmatpush3.xpose.msk.msra.mxu0 %vm737_vm2, %v2245_v11  ;;  %v3218_v11 = vld [vmem:[%s4432_s6 + $0x30] sm:$0xff] }
 0xe93   : > { %3485 = vmatprep.subr.mxu0 %v3807_v36 }
 0xe95   : > { %3478 = vmatmul.mubr.msk.f32.vlgmr.msra.gmra.mrb[12].mxu0 %vm737_vm2, %v4210_v7  ;;  %v2410_v13 = vpop.permute.xlu1 %2409 }
 0xe96   : > { %3486 = vmatpush3.xpose.msk.msra.mxu0 %vm737_vm2, %v2412_v12  ;;  %3487 = vmatprep.mubr.msk.f32.mxu0 %vm3808_vm1, %v3807_v36  ;;  %v3595_v12 = vpack.c.bf16 %v3217_v10, %v3216_v9  ;;  %v3239_v9 = vld [vmem:[%s4438_s12 + $0x58] sm:$0xff]  ;;  %v3240_v10 = vld [vmem:[%s4438_s12 + $0x60] sm:$0xff] }
 0xe98   : > { %3596 = vmatprep.subr.bf16.mxu0 %v3595_v12 }
 0xe99   : > { %3488 = vmatmul.mubr.msk.f32.vlgmr.msra.gmra.mrb[14].mxu0 %vm737_vm2, %v2410_v13  ;;  %v3219_v13 = vld [vmem:[%s4432_s6 + $0x38] sm:$0xff] }
 0xe9a   : > { %3598 = vmatpush3.bf16.msra.mxu0 %v3595_v12 }
 0xf60   : > { %v1978_v14 = vpop.f32.mrb[16].mxu1 }
 0xf61   : > { %v1982_v15 = vmul.f32 0.25, %v1978_v14  ;;  %v3459_v16 = vpop.f32.mrb[17].mxu1  ;;  %v2145_v17 = vpop.f32.mrb[10].mxu0  ;;  %v3599_v14 = vpack.c.bf16 %v3219_v13, %v3218_v11  ;;  %v3241_v11 = vld [vmem:[%s4438_s12 + $0x68] sm:$0xff]  ;;  %v3242_v13 = vld [vmem:[%s4438_s12 + $0x70] sm:$0xff] }
 0xf62   : > { %v2149_v18 = vmul.f32 0.25, %v2145_v17  ;;  %v3469_v19 = vpop.f32.mrb[11].mxu0  ;;  %v3619_v12 = vpack.c.bf16 %v3241_v11, %v3240_v10 }
 0xf63   : > { %v1983_v20 = vadd.f32 %v1982_v15, %v4035_v51  ;;  %3600 = vmatprep.subr.bf16.mxu0 %v3599_v14 }
 0xf64   : > { %v2150_v21 = vadd.f32 %v2149_v18, %v4035_v51  ;;  %3602 = vmatpush3.bf16.msra.mxu0 %v3599_v14  ;;  %v3243_v14 = vld [vmem:[%s4438_s12 + $0x78] sm:$0xff] }
 0xf65   : > { %v1984_v22 = vsel %vm818_vm3, %v1983_v20, -inf }
 0xf66   : > { %1985 = vmax.xlane.f32.xlu0 %v1984_v22  ;;  %v2151_v23 = vsel %vm818_vm3, %v2150_v21, -inf }
 0xf67   : > { %2152 = vmax.xlane.f32.xlu1 %v2151_v23 }
 0xf68   : > { %v2316_v24 = vpop.f32.mrb[12].mxu0 }
 0xf69   : > { %v2320_v25 = vmul.f32 0.25, %v2316_v24  ;;  %v3479_v35 = vpop.f32.mrb[13].mxu0 }
 0xf6b   : > { %v2321_v33 = vadd.f32 %v2320_v25, %v4039_v58 }
 0xf6c   : > { %v2483_v26 = vpop.f32.mrb[14].mxu0 }
 0xf6d   : > { %v2487_v27 = vmul.f32 0.25, %v2483_v26  ;;  %v3489_v28 = vpop.f32.mrb[15].mxu0  ;;  %v2322_v29 = vsel %vm818_vm3, %v2321_v33, -inf }
 0xf6e   : > { %2323 = vmax.xlane.f32.xlu0 %v2322_v29 }
 0xf6f   : > { %v2488_v30 = vadd.f32 %v2487_v27, %v4039_v58 }
 0xf71   : > { %v2489_v51 = vsel %vm818_vm3, %v2488_v30, -inf }
 0xf72   : > { %2490 = vmax.xlane.f32.xlu0 %v2489_v51 }
 0xff3   : > { %v1986_v31 = vpop.xlane.xlu0 %1985 }
 0xff4   : > { %v1987_v32 = vsub.f32 %v1983_v20, %v1986_v31  ;;  %v2153_v34 = vpop.xlane.xlu1 %2152 }
 0xff5   : > { %v2154_v37 = vsub.f32 %v2150_v21, %v2153_v34 }
 0xff6   : > { %v1988_v38 = vmul.f32 1.442695, %v1987_v32 }
 0xff7   : > { %v2155_v39 = vmul.f32 1.442695, %v2154_v37 }
 0xff8   : > { %3713 = vpow2.f32 %v1988_v38 }
 0xff9   : > { %3715 = vpow2.f32 %v2155_v39 }
 0xffb   : > { %v2324_v42 = vpop.xlane.xlu0 %2323 }
 0xffc   : > { %v2325_v43 = vsub.f32 %v2321_v33, %v2324_v42  ;;  %v3221_v33 = vld [vmem:[%s4433_s7 + $0x1] ss:$0 sm:$0xff] }
 0xffe   : > { %v2326_v40 = vmul.f32 1.442695, %v2325_v43 }
 0xfff   : > { %v2491_v49 = vpop.xlane.xlu0 %2490 }
0x1000   : > { %3717 = vpow2.f32 %v2326_v40  ;;  %v2492_v50 = vsub.f32 %v2488_v30, %v2491_v49 }
0x1002   : > { %v3714_v44 = vpop.eup %3713  ;;  %v2493_v52 = vmul.f32 1.442695, %v2492_v50 }
0x1003   : > { %v3716_v45 = vpop.eup %3715  ;;  %v1990_v46 = vsel %vm818_vm3, %v3714_v44, 0.0 }
0x1004   : > { %1991 = vadd.xlane.f32.xlu0 %v1990_v46  ;;  %v2157_v58 = vsel %vm818_vm3, %v3716_v45, 0.0  ;;  %3719 = vpow2.f32 %v2493_v52  ;;  %v3229_v46 = vld [vmem:[%s4436_s10 + $0x28] sm:$0xff] }
0x1005   : > { %2158 = vadd.xlane.f32.xlu1 %v2157_v58 }
0x100a   : > { %v3718_v47 = vpop.eup %3717 }
0x100b   : > { %v2328_v48 = vsel %vm818_vm3, %v3718_v47, 0.0 }
0x100c   : > { %2329 = vadd.xlane.f32.xlu0 %v2328_v48  ;;  %v3231_v48 = vld [vmem:[%s4436_s10 + $0x38] sm:$0xff] }
0x100e   : > { %v3720_v53 = vpop.eup %3719 }
0x100f   : > { %v2495_v41 = vsel %vm818_vm3, %v3720_v53, 0.0 }
0x1016   : > { %2162 = vrot.lane.b32.xlu1 %v4204_v6, %s4475_s22 }
0x101a   : > { %2333 = vrot.lane.b32.xlu1 %v4210_v7, %s4476_s24 }
0x1022   : > { %1995 = vrot.lane.b32.xlu0 %v4204_v6, %s4476_s24  ;;  %s4477_s24 = smov 16  }
0x103e   : > { %2496 = vadd.xlane.f32.xlu1 %v2495_v41 }
0x104f   : > { %2500 = vrot.lane.b32.xlu1 %v4210_v7, %s4475_s22  ;;  %s3087_s22 = sshll.u32 %s581_s25, 4  ;;  %s4386_s22 = int_to_ptr.vmem [resolvable:$true] %s3087_s22 }
0x1050   : > { %s3743_s29 = scalar_lea.vmem %s4386_s22, 32  ;;  %p3750_p0 = scmp.lt.s32.totalorder %s4386_s22, %s3748_s20 }
0x1051   : > { %p3744_p11 = scmp.ne.s32.totalorder %s4386_s22, %s3743_s29  ;;  %p3751_p1 = scmp.lt.s32.totalorder %s3749_s4, %s3743_s29 }
0x1053   : > { %p3745_p12 = pnand %p3744_p11, %p3950_p5  ;;  %p3752_p2 = por %p3751_p1, %p3750_p0 }
0x1055   : > { %p3746_p13 = pneg %p3745_p12 }
0x1057   : > { %p3753_p3 = pnand %p3752_p2, %p3746_p13 }
0x1091   : > { %v1992_v54 = vpop.xlane.xlu0 %1991 }
0x1092   : > { %3721 = vrcp.f32 %v1992_v54  ;;  %v2159_v55 = vpop.xlane.xlu1 %2158 }
0x1093   : > { %3723 = vrcp.f32 %v2159_v55 }
0x1096   : > { %v2163_v60 = vpop.permute.xlu1 %2162 }
0x1099   : > { %v2330_v56 = vpop.xlane.xlu0 %2329 }
0x109a   : > { %3725 = vrcp.f32 %v2330_v56  ;;  %v2334_v0 = vpop.permute.xlu1 %2333 }
0x109c   : > { %v3722_v57 = vpop.eup %3721 }
0x109d   : > { %v1994_v59 = vmul.f32 %v3722_v57, %v3714_v44  ;;  %v1996_v61 = vpop.permute.xlu0 %1995  ;;  %v3724_v62 = vpop.eup %3723  ;;  %v3226_v57 = vld [vmem:[%s4434_s8 + $0x1] ss:$0 sm:$0xff] }
0x109e   : > { %3461 = vmatpush3.msra.mxu1 %v1996_v61  ;;  %v2161_v63 = vmul.f32 %v3724_v62, %v3716_v45 }
0x109f   : > { %3463 = vmatmul.mubr.msk.f32.vlgmr.msra.gmra.mrb[18].mxu1 %vm818_vm3, %v1994_v59  ;;  %3470 = vmatprep.subr.mxu1 %v3807_v36 }
0x10a0   : > { %3471 = vmatpush3.msra.mxu1 %v2163_v60  ;;  %3472 = vmatprep.mubr.msk.f32.mxu1 %vm3808_vm1, %v3807_v36  ;;  %v3227_v60 = vld [vmem:[%s4435_s9 + $0x1] ss:$0 sm:$0xff] }
0x10a1   : > { %3480 = vmatprep.subr.mxu1 %v3807_v36 }
0x10a3   : > { %3473 = vmatmul.mubr.msk.f32.vlgmr.msra.gmra.mrb[20].mxu1 %vm818_vm3, %v2161_v63 }
0x10a4   : > { %v3726_v3 = vpop.eup %3725  ;;  %3481 = vmatpush3.msra.mxu1 %v2334_v0  ;;  %3482 = vmatprep.mubr.msk.f32.mxu1 %vm3808_vm1, %v3807_v36 }
0x10a5   : > { %v2332_v4 = vmul.f32 %v3726_v3, %v3718_v47  ;;  %3490 = vmatprep.subr.mxu1 %v3807_v36  ;;  %v3230_v47 = vld [vmem:[%s4436_s10 + $0x30] sm:$0xff] }
0x10a6   : > { %v3607_v49 = vpack.c.bf16 %v3231_v48, %v3230_v47 }
0x10a7   : > { %3483 = vmatmul.mubr.msk.f32.vlgmr.msra.gmra.mrb[22].mxu1 %vm818_vm3, %v2332_v4 }
0x10a8   : > { %3492 = vmatprep.mubr.msk.f32.mxu1 %vm3808_vm1, %v3807_v36 }
0x10cb   : > { %v2497_v5 = vpop.xlane.xlu1 %2496 }
0x10cc   : > { %3727 = vrcp.f32 %v2497_v5  ;;  %v3236_v5 = vld [vmem:[%s4438_s12 + $0x40] sm:$0xff] }
0x10cf   : > { %v2501_v6 = vpop.permute.xlu1 %2500 }
0x10d0   : > { %3491 = vmatpush3.msra.mxu1 %v2501_v6  ;;  %v3237_v6 = vld [vmem:[%s4438_s12 + $0x48] sm:$0xff] }
0x10d6   : > { %v3728_v7 = vpop.eup %3727 }
0x10d7   : > { %v2499_v8 = vmul.f32 %v3728_v7, %v3720_v53  ;;  %v3611_v7 = vpack.c.bf16 %v3237_v6, %v3236_v5 }
0x10d9   : > { %3493 = vmatmul.mubr.msk.f32.vlgmr.msra.gmra.mrb[24].mxu1 %vm818_vm3, %v2499_v8  ;;  %3612 = vmatprep.subr.bf16.mxu0 %v3611_v7  ;;  %v3238_v8 = vld [vmem:[%s4438_s12 + $0x50] sm:$0xff] }
0x1172   : > { %v2067_v15 = vpop.f32.mrb[18].mxu1 }
0x1173   : > { %v3464_v16 = vpop.f32.mrb[19].mxu1 }
0x1174   : > { %v3233_v16 = vld [vmem:[%s4437_s11 + $0x1] ss:$0 sm:$0xff] }
0x1176   : > { %v2234_v17 = vpop.f32.mrb[20].mxu1 }
0x1177   : > { %2239 = vrot.lane.b32.xlu0 %v2234_v17, %s4477_s24  ;;  %v3474_v18 = vpop.f32.mrb[21].mxu1 }
0x117a   : > { %v2405_v19 = vpop.f32.mrb[22].mxu1 }
0x117b   : > { %v3484_v20 = vpop.f32.mrb[23].mxu1 }
0x11ac   : > { %v2572_v21 = vpop.f32.mrb[24].mxu1 }
0x11ad   : > { %2577 = vrot.lane.b32.xlu1 %v2572_v21, %s4477_s24  ;;  %v3494_v22 = vpop.f32.mrb[25].mxu1 }
0x11e9   : > { %v2240_v23 = vpop.permute.xlu0 %2239 }
0x11ea   : > { %v2242_v24 = vsel %vm737_vm2, %v2067_v15, %v2240_v23  ;;  %v3623_v15 = vpack.c.bf16 %v3243_v14, %v3242_v13 }
0x11eb   : > { %3503 = vmatprep.mubr.msk.f32.mxu0 %vm598_vm0, %v2242_v24 }
0x121f   : > { %v2578_v25 = vpop.permute.xlu1 %2577 }
0x1220   : > { %v2580_v35 = vsel %vm737_vm2, %v2405_v19, %v2578_v25 }
0x1221   : > { %3504 = vmatmul.mubr.msk.f32.vlgmr.msra.gmra.mrb[16].mxu0 %vm598_vm0, %v2580_v35 }
0x1222   : > { %3614 = vmatpush3.bf16.msra.mxu0 %v3611_v7 }
0x12f4   : > { %v3505_v26 = vpop.f32.mrb[16].mxu0 }
0x12f5   : > { %v2672_v27 = vadd.f32 %v3505_v26, %v3221_v33  ;;  %v2666_v28 = vpop.f32.mrb[17].mxu0 }
0x12f6   : > { %v2667_v29 = vadd.f32 %v3221_v33, %v2666_v28 }
0x12f7   : > { %v2676_v30 = vadd.f32 %v2672_v27, %v4193_v2 }
0x12f8   : > { %v2675_v51 = vadd.f32 %v2667_v29, %v4191_v1  ;;  %v3228_v1 = vld [vmem:[%s4436_s10 + $0x20] sm:$0xff] }
0x12f9   : > { %v2684_v31 = vsel %vm598_vm0, %v2676_v30, 0.0  ;;  %v3603_v58 = vpack.c.bf16 %v3229_v46, %v3228_v1 }
0x12fa   : > { %2685 = vadd.xlane.f32.xlu1 %v2684_v31  ;;  %v2681_v32 = vsel %vm598_vm0, %v2675_v51, 0.0 }
0x12fb   : > { %2682 = vadd.xlane.f32.xlu0 %v2681_v32  ;;  %3604 = vmatprep.subr.bf16.mxu1 %v3603_v58 }
0x12fc   : > { %3606 = vmatpush3.bf16.msra.mxu1 %v3603_v58 }
0x12fd   : > { %3608 = vmatprep.subr.bf16.mxu1 %v3607_v49 }
0x1300   : > { %3610 = vmatpush3.bf16.msra.mxu1 %v3607_v49 }
0x1387   : > { %v2686_v34 = vpop.xlane.xlu1 %2685 }
0x1388   : > { %v2688_v37 = vmul.f32 0.03125, %v2686_v34  ;;  %v2683_v38 = vpop.xlane.xlu0 %2682 }
0x1389   : > { %v2687_v39 = vmul.f32 0.03125, %v2683_v38 }
0x138a   : > { %v2690_v42 = vsub.f32 %v2676_v30, %v2688_v37 }
0x138b   : > { %v2689_v43 = vsub.f32 %v2675_v51, %v2687_v39  ;;  %v3245_v39 = vld [vmem:[%s4439_s13 + $0x1] ss:$0 sm:$0xff] }
0x138c   : > { %v2692_v45 = vmul.f32 %v2690_v42, %v2690_v42 }
0x138d   : > { %v2691_v40 = vmul.f32 %v2689_v43, %v2689_v43 }
0x138e   : > { %v2696_v2 = vsel %vm598_vm0, %v2692_v45, 0.0 }
0x138f   : > { %v2693_v44 = vsel %vm598_vm0, %v2691_v40, 0.0 }
0x1390   : > { %2694 = vadd.xlane.f32.xlu0 %v2693_v44 }
0x1394   : > { %2697 = vadd.xlane.f32.xlu0 %v2696_v2 }
0x141d   : > { %v2695_v50 = vpop.xlane.xlu0 %2694 }
0x141e   : > { %v2699_v52 = vmul.f32 0.03125, %v2695_v50 }
0x1420   : > { %v2701_v53 = vadd.f32 1e-12, %v2699_v52 }
0x1421   : > { %v2698_v41 = vpop.xlane.xlu0 %2697 }
0x1422   : > { %3729 = vrsqrt.f32 %v2701_v53  ;;  %v2700_v54 = vmul.f32 0.03125, %v2698_v41 }
0x1424   : > { %v2702_v55 = vadd.f32 1e-12, %v2700_v54 }
0x1426   : > { %3731 = vrsqrt.f32 %v2702_v55 }
0x142c   : > { %v3730_v56 = vpop.eup %3729 }
0x142d   : > { %v2705_v59 = vmul.f32 %v3730_v56, %v2689_v43  ;;  %v2986_v56 = vld [vmem:[%s4442_s16] sm:$0xff] }
0x142f   : > { %v2713_v61 = vmul.f32 %v3226_v57, %v2705_v59 }
0x1430   : > { %v3732_v62 = vpop.eup %3731 }
0x1431   : > { %v2706_v63 = vmul.f32 %v3732_v62, %v2690_v42  ;;  %v2721_v0 = vadd.f32 %v3227_v60, %v2713_v61  ;;  %v2989_v61 = vld [vmem:[%s4442_s16 + $0x18] sm:$0xff]  ;;  %v3815_v62 = vmov 0.0|0.0  }
0x1432   : > { %3627 = vmatprep.subr.bf16.mxu1 %v3815_v62 }
0x1433   : > { %v2714_v3 = vmul.f32 %v3226_v57, %v2706_v63  ;;  %3514 = vmatprep.mubr.msk.f32.mxu1 %vm598_vm0, %v2721_v0  ;;  %v2987_v57 = vld [vmem:[%s4442_s16 + $0x8] sm:$0xff] }
0x1434   : > { %v3628_v59 = vpack.c.bf16 %v2987_v57, %v2986_v56 }
0x1435   : > { %v2722_v4 = vadd.f32 %v3227_v60, %v2714_v3  ;;  %v2988_v60 = vld [vmem:[%s4442_s16 + $0x10] sm:$0xff] }
0x1436   : > { %v3631_v63 = vpack.c.bf16 %v2989_v61, %v2988_v60 }
0x1437   : > { %3515 = vmatmul.mubr.msk.f32.vlgmr.msra.gmra.mrb[26].mxu1 %vm598_vm0, %v2722_v4 }
0x1438   : > { %3544 = vmatprep.mubr.msk.f32.mxu1 %vm3808_vm1, %v3807_v36  ;;  %v3615_v36 = vpack.c.bf16 %v3239_v9, %v3238_v8  ;;  %3629 = vmatpush3.bf16.msra.mxu1 %v3628_v59  ;;  %v3250_v9 = vld [vmem:[%s4440_s14 + $0x1] ss:$0 sm:$0xff] }
0x1439   : > { %3630 = vmatprep.subr.bf16.mxu1 %v3815_v62 }
0x143a   : > { %3616 = vmatprep.subr.bf16.mxu0 %v3615_v36 }
0x143b   : > { %3618 = vmatpush3.bf16.msra.mxu0 %v3615_v36 }
0x143c   : > { %3620 = vmatprep.subr.bf16.mxu0 %v3619_v12  ;;  %3632 = vmatpush3.bf16.msra.mxu1 %v3631_v63 }
0x143f   : > { %3622 = vmatpush3.bf16.msra.mxu0 %v3619_v12  ;;  %v3251_v12 = vld [vmem:[%s4441_s15 + $0x1] ss:$0 sm:$0xff] }
0x1440   : > { %3624 = vmatprep.subr.bf16.mxu0 %v3623_v15 }
0x1443   : > { %3626 = vmatpush3.bf16.msra.mxu0 %v3623_v15 }
0x150a   : > { %v3516_v17 = vpop.f32.mrb[26].mxu1 }
0x150b   : > { %v2814_v18 = vadd.f32 %v3516_v17, %v3233_v16  ;;  %v2808_v19 = vpop.f32.mrb[27].mxu1 }
0x150c   : > { %v2809_v20 = vadd.f32 %v3233_v16, %v2808_v19  ;;  %v3252_v19 = vld [vmem:[%s4443_s17] ss:$0 sm:$0xff] }
0x150d   : > { %v2818_v21 = vmul.f32 %v2814_v18, %v2814_v18 }
0x150e   : > { %v2817_v22 = vmul.f32 %v2809_v20, %v2809_v20 }
0x150f   : > { %v2820_v23 = vmul.f32 %v2818_v21, %v2814_v18 }
0x1510   : > { %v2819_v24 = vmul.f32 %v2817_v22, %v2809_v20 }
0x1511   : > { %v2822_v25 = vmul.f32 0.044715, %v2820_v23 }
0x1512   : > { %v2821_v35 = vmul.f32 0.044715, %v2819_v24 }
0x1513   : > { %v2824_v33 = vadd.f32 %v2822_v25, %v2814_v18 }
0x1514   : > { %v2823_v26 = vadd.f32 %v2821_v35, %v2809_v20 }
0x1515   : > { %v2826_v27 = vmul.f32 0.7978846, %v2824_v33 }
0x1516   : > { %v2825_v28 = vmul.f32 0.7978846, %v2823_v26 }
0x1517   : > { %3733 = vtanh.f32 %v2826_v27 }
0x1518   : > { %3735 = vtanh.f32 %v2825_v28 }
0x1521   : > { %v3734_v29 = vpop.eup %3733 }
0x1522   : > { %v3736_v30 = vpop.eup %3735  ;;  %v2830_v51 = vadd.f32 1.0, %v3734_v29 }
0x1523   : > { %v2829_v31 = vadd.f32 1.0, %v3736_v30 }
0x1524   : > { %v2832_v32 = vmul.f32 0.5, %v2830_v51 }
0x1525   : > { %v2831_v34 = vmul.f32 0.5, %v2829_v31 }
0x1526   : > { %v2834_v38 = vmul.f32 %v2832_v32, %v2814_v18 }
0x1527   : > { %v2833_v37 = vmul.f32 %v2831_v34, %v2809_v20 }
0x1529   : > { %3533 = vmatprep.mubr.msk.f32.mxu0 %vm1683_vm4, %v2833_v37 }
0x152a   : > { %3534 = vmatmul.mubr.msk.f32.vlgmr.msra.gmra.mrb[18].mxu0 %vm1683_vm4, %v2834_v38 }
0x15fd   : > { %v3535_v42 = vpop.f32.mrb[18].mxu0 }
0x15fe   : > { %v2930_v43 = vadd.f32 %v3535_v42, %v3245_v39  ;;  %v2924_v40 = vpop.f32.mrb[19].mxu0 }
0x15ff   : > { %v2925_v44 = vadd.f32 %v3245_v39, %v2924_v40 }
0x1600   : > { %v2934_v45 = vadd.f32 %v2930_v43, %v2722_v4 }
0x1601   : > { %v2933_v2 = vadd.f32 %v2925_v44, %v2721_v0 }
0x1602   : > { %v2942_v1 = vsel %vm598_vm0, %v2934_v45, 0.0 }
0x1603   : > { %2943 = vadd.xlane.f32.xlu0 %v2942_v1  ;;  %v2939_v46 = vsel %vm598_vm0, %v2933_v2, 0.0 }
0x1604   : > { %2940 = vadd.xlane.f32.xlu1 %v2939_v46 }
0x1690   : > { %v2944_v58 = vpop.xlane.xlu0 %2943 }
0x1691   : > { %v2946_v47 = vmul.f32 0.03125, %v2944_v58  ;;  %v2941_v48 = vpop.xlane.xlu1 %2940 }
0x1692   : > { %v2945_v49 = vmul.f32 0.03125, %v2941_v48 }
0x1693   : > { %v2948_v50 = vsub.f32 %v2934_v45, %v2946_v47 }
0x1694   : > { %v2947_v52 = vsub.f32 %v2933_v2, %v2945_v49 }
0x1695   : > { %v2950_v53 = vmul.f32 %v2948_v50, %v2948_v50 }
0x1696   : > { %v2949_v41 = vmul.f32 %v2947_v52, %v2947_v52 }
0x1697   : > { %v2954_v54 = vsel %vm598_vm0, %v2950_v53, 0.0 }
0x1698   : > { %2955 = vadd.xlane.f32.xlu0 %v2954_v54  ;;  %v2951_v55 = vsel %vm598_vm0, %v2949_v41, 0.0 }
0x1699   : > { %2952 = vadd.xlane.f32.xlu1 %v2951_v55 }
0x1725   : > { %v2956_v0 = vpop.xlane.xlu0 %2955 }
0x1726   : > { %v2958_v3 = vmul.f32 0.03125, %v2956_v0  ;;  %v2953_v4 = vpop.xlane.xlu1 %2952 }
0x1727   : > { %v2957_v5 = vmul.f32 0.03125, %v2953_v4 }
0x1728   : > { %v2960_v6 = vadd.f32 1e-12, %v2958_v3 }
0x1729   : > { %v2959_v7 = vadd.f32 1e-12, %v2957_v5 }
0x172a   : > { %3737 = vrsqrt.f32 %v2960_v6 }
0x172b   : > { %3739 = vrsqrt.f32 %v2959_v7 }
0x1734   : > { %v3738_v8 = vpop.eup %3737 }
0x1735   : > { %v3740_v36 = vpop.eup %3739  ;;  %v2964_v10 = vmul.f32 %v3738_v8, %v2948_v50 }
0x1736   : > { %v2963_v11 = vmul.f32 %v3740_v36, %v2947_v52 }
0x1737   : > { %v2972_v13 = vmul.f32 %v3250_v9, %v2964_v10 }
0x1738   : > { %v2971_v14 = vmul.f32 %v3250_v9, %v2963_v11 }
0x1739   : > { %v2980_v15 = vadd.f32 %v3251_v12, %v2972_v13 }
0x173a   : > { %v2979_v16 = vadd.f32 %v3251_v12, %v2971_v14 }
0x173b   : > { %v2982_v17 = vrot.slane %v2980_v15, 7 }
0x173d   : > { %v2985_v18 = vsel %vm2984_vm5, %v2979_v16, %v2982_v17 }
0x173e   : > { %3545 = vmatmul.mubr.msk.f32.vlgmr.msra.gmra.mrb[28].mxu1 %vm598_vm0, %v2985_v18 }
0x1811   : > { %v3066_v20 = vpop.f32.mrb[28].mxu1 }
0x1812   : > { %v3067_v21 = vadd.f32 %v3252_v19, %v3066_v20  ;;  %v3546_v22 = vpop.f32.mrb[29].mxu1 }
0x1814   : > { %3741 = vtanh.f32 %v3067_v21 }
0x181e   : > { %v3742_v23 = vpop.eup %3741 }
0x181f   : > { %3072 = vst.msk [vmem:[%s581_s25] sm:$0x3] %vm3071_vm6, %v3742_v23 }
0x1820   : > { %3756 = shalt.err (!%p3753_p3)
}
0x1821   : > { %s3757_s19 = scalar_lea.hbm %s4384_s3, 32  ;;  %s3761_s24 = scalar_lea.hbm %s4444_s18, 64 }
0x1822   : > { %p3758_p4 = scmp.ne.s32.totalorder %s4384_s3, %s3757_s19  ;;  %p3762_p9 = scmp.lt.u32.totalorder %s4384_s3, %s4444_s18 }
0x1823   : > { %p3763_p10 = scmp.lt.u32.totalorder %s3761_s24, %s3757_s19  ;;  %p3765_p12 = scmp.lt.u32.totalorder %s3757_s19, %s4384_s3 }
0x1824   : > { %p3759_p7 = pnand %p3758_p4, %p3950_p5 }
0x1825   : > { %p3764_p11 = por %p3763_p10, %p3762_p9 }
0x1826   : > { %p3760_p8 = pneg %p3759_p7 }
0x1827   : > { %p3766_p13 = por %p3765_p12, %p3764_p11 }
0x1829   : > { %p3767_p0 = pnand %p3766_p13, %p3760_p8 }
0x182b   : > { %3770 = shalt.err (!%p3767_p0)
}
0x182c   : > { %3633 = dma.vmem_to_hbm [thread:$0]  (%p3950_p5), %s4386_s22, 32, %s4384_s3, %s3074_s1  }
0x182d PF: > { %p3639_p1 = scmp.ge.s32.totalorder %s3805_s30, 2  ;;  %s3099_s4 = sand.u32 1, %s3793_s27  }
0x182e   : > { %s3100_s29 = scalar_lea.sflag [#allocation3], %s3099_s4 }
0x182f   : > { %p3636_p2 = pnand %p3639_p1, %p3954_p6 }
0x1831   : > { %3788 = dma.done.wait (!%p3636_p2), %s3100_s29, 32  }
0x1832   : > { %3790 = vsyncadd (!%p3636_p2), %s3100_s29, 4294967264  ;;  %s4478_s30 = sld [smem:[#allocation6_spill]]  ;;  %s4479_s20 = sld [smem:[#allocation5_spill]] }
0x1833   : > { %s4480_s29 = sld [smem:[#allocation7_spill]]  ;;  %s4481_s27 = smov %s3797_s28 }
0x1838   : > { %p28_p3 = scmp.ge.s32.totalorder %s4478_s30, 4   ;;  %s4482_s28 = smov %s4479_s20 }
0x183a   :  { %30 = sbr.rel (!%p28_p3) target bundleno = 9 (0x9), region = 142 }
0x1841   :  { %3105 = vsyncpa [#allocation3], 1 }
0x1842   :  { %3107 = vsyncpa [#allocation3 + $0x1], 1 }

</bundles_post_ra>
